<compile_context>
chip_gen: v5e
topology: v5e:2x2
jax: 0.10.0
libtpu: 0.0.40
codegen_flags: <defaults>
</compile_context>

<pallas_src>
import jax
import jax.numpy as jnp
from jax.experimental import pallas as pl
from jax.experimental.pallas import tpu as pltpu

SIZES = [784, 256, 32, 10, 32, 256, 784]
FEAT = 784


def _round_up(x, m):
    return (x + m - 1) // m * m


def _autoencoder_kernel(x_ref,
                        w1, b1, w2, b2, w3, b3,
                        w4, b4, w5, b5, w6, b6,
                        out_ref):
    """Fused 6-layer MLP on one (TB, 784) batch tile: 5x(Linear+ReLU) + Linear+Sigmoid.

    Weights are bf16 and VMEM-resident across the whole batch grid; matmuls
    accumulate in f32 via preferred_element_type; the output tile is bf16.
    """
    h = x_ref[...]  # f32 (TB, FEAT); cast to bf16 per-matmul below

    def linear(h, w_ref, b_ref):
        return jnp.dot(h.astype(jnp.bfloat16), w_ref[...],
                       preferred_element_type=jnp.float32) + b_ref[...]

    # Encoder
    h = jnp.maximum(linear(h, w1, b1), 0.0)
    h = jnp.maximum(linear(h, w2, b2), 0.0)
    h = jnp.maximum(linear(h, w3, b3), 0.0)
    # Decoder
    h = jnp.maximum(linear(h, w4, b4), 0.0)
    h = jnp.maximum(linear(h, w5, b5), 0.0)
    h = linear(h, w6, b6)  # f32 (TB, FEAT)

    # sigmoid(h) = 1 / (1 + exp(-h)) -- exp and approx-reciprocal both go to the
    # EUP, whose slot is otherwise idle while the MXU/VPU work. f32 math throughout.
    sig = pl.reciprocal(1.0 + jnp.exp(-h), approx=True)
    out_ref[...] = sig.astype(out_ref.dtype)


def autoencoder_forward(x, params, *, tb=512):
    """x: [B, ...] with prod(...) == 784.  Returns [B, 784] bfloat16 (cast outside if f32 needed)."""
    B = x.shape[0]
    x2d = x.reshape(B, -1)
    assert x2d.shape[1] == FEAT, "flattened input must have 784 features"

    # Batch tile: largest multiple of 8 that covers B, capped at `tb`.
    TB = min(tb, _round_up(B, 8))
    # v7x has 2 TensorCores: when the whole batch would fit in a single grid step,
    # halve the tile so megacore sharding has >=2 steps to split (harmless on v5e/v6e).
    if TB >= 16 and _round_up(B, TB) == TB:
        TB = _round_up((TB + 1) // 2, 8)
    Bp = _round_up(B, TB)

    # Only wrapper-side copy left: zero-pad ragged batches up to a TB multiple.
    if Bp != B:
        x2d = jnp.pad(x2d, ((0, Bp - B), (0, 0)))

    # Flatten (W, b) pairs; bf16 [in, out] weights (y = x @ W + b == nn.Linear),
    # f32 (1, out) biases. No feature padding needed: every block either has
    # lane-dim a multiple of 128 or equals the full array dim.
    flat_args = []
    for w, b in params:
        flat_args.append(w.astype(jnp.bfloat16))
        flat_args.append(b.astype(jnp.float32).reshape(1, -1))

    # Weights/biases: full-array blocks with constant index map -> fetched once,
    # VMEM-resident across all batch steps. (pl.Buffered(1) single-buffering would
    # shave ~1 MiB more VMEM but is not needed at this budget.)
    def const_spec(a):
        return pl.BlockSpec(a.shape, lambda i: (0, 0))

    in_specs = [pl.BlockSpec((TB, FEAT), lambda i: (i, 0))] + \
               [const_spec(a) for a in flat_args]
    out_spec = pl.BlockSpec((TB, FEAT), lambda i: (i, 0))

    out = pl.pallas_call(
        _autoencoder_kernel,
        out_shape=jax.ShapeDtypeStruct((Bp, FEAT), jnp.bfloat16),
        grid=(Bp // TB,),
        in_specs=in_specs,
        out_specs=out_spec,
        compiler_params=pltpu.CompilerParams(
            dimension_semantics=("parallel",),   # shards batch steps across TCs on v7x
            vmem_limit_bytes=32 * 1024 * 1024),  # explicit budget, safe on v7x's 64 MiB VMEM
    )(x2d, *flat_args)

    if Bp != B:
        out = out[:B]
    return out


def init_params(key, sizes=SIZES):
    """Deterministic init mirroring PyTorch nn.Linear default (U[-1/sqrt(fan_in), +])."""
    params = []
    for i in range(len(sizes) - 1):
        fan_in, fan_out = sizes[i], sizes[i + 1]
        key, kw, kb = jax.random.split(key, 3)
        bound = 1.0 / jnp.sqrt(jnp.float32(fan_in))
        # Stored as [in, out] (i.e. W^T of the PyTorch [out, in] weight).
        w = jax.random.uniform(kw, (fan_in, fan_out), jnp.float32, -bound, bound)
        b = jax.random.uniform(kb, (fan_out,), jnp.float32, -bound, bound)
        params.append((w, b))
    return params


def _reference_forward(x, params):
    """Pure-JAX reference mirroring the kernel's bf16-weight / f32-accumulate math."""
    h = x.reshape(x.shape[0], -1).astype(jnp.float32)
    for i, (w, b) in enumerate(params):
        h = jnp.dot(h.astype(jnp.bfloat16), w.astype(jnp.bfloat16),
                    preferred_element_type=jnp.float32) + b.astype(jnp.float32)
        if i < len(params) - 1:
            h = jnp.maximum(h, 0.0)
        else:
            h = jax.nn.sigmoid(h)
    return h


if __name__ == "__main__":
    key = jax.random.PRNGKey(0)
    k_params, k_x1, k_x2 = jax.random.split(key, 3)

    params = init_params(k_params)

    fwd = jax.jit(autoencoder_forward, static_argnames=("tb",))

    # Small MNIST-like batch: [8, 1, 28, 28] -> single grid step (TB=8).
    x_small = jax.random.uniform(k_x1, (8, 1, 28, 28), jnp.float32)
    out_small = jax.block_until_ready(fwd(x_small, params, tb=512))
    ref_small = jax.block_until_ready(_reference_forward(x_small, params))
    assert out_small.shape == (8, 784), out_small.shape
    assert out_small.dtype == jnp.bfloat16, out_small.dtype
    assert jnp.allclose(out_small.astype(jnp.float32), ref_small, atol=1e-2), \
        "small-batch mismatch vs JAX reference"

    # Ragged larger batch: exercises the batch grid (auto-split into 2 steps of 152)
    # plus the padded last tile.
    x_big = jax.random.uniform(k_x2, (300, 1, 28, 28), jnp.float32)
    out_big = jax.block_until_ready(fwd(x_big, params, tb=512))
    ref_big = jax.block_until_ready(_reference_forward(x_big, params))
    assert out_big.shape == (300, 784), out_big.shape
    assert jnp.allclose(out_big.astype(jnp.float32), ref_big, atol=1e-2), \
        "gridded-batch mismatch vs JAX reference"

    print("KERNEL_OK")
</pallas_src>

<mosaic_0001>
module attributes {stable_mosaic.version = 11 : i64} {
  func.func @_autoencoder_kernel(%arg0: i32, %arg1: memref<8x784xf32, #tpu.memory_space<vmem>>, %arg2: memref<784x256xbf16, #tpu.memory_space<vmem>>, %arg3: memref<1x256xf32, #tpu.memory_space<vmem>>, %arg4: memref<256x32xbf16, #tpu.memory_space<vmem>>, %arg5: memref<1x32xf32, #tpu.memory_space<vmem>>, %arg6: memref<32x10xbf16, #tpu.memory_space<vmem>>, %arg7: memref<1x10xf32, #tpu.memory_space<vmem>>, %arg8: memref<10x32xbf16, #tpu.memory_space<vmem>>, %arg9: memref<1x32xf32, #tpu.memory_space<vmem>>, %arg10: memref<32x256xbf16, #tpu.memory_space<vmem>>, %arg11: memref<1x256xf32, #tpu.memory_space<vmem>>, %arg12: memref<256x784xbf16, #tpu.memory_space<vmem>>, %arg13: memref<1x784xf32, #tpu.memory_space<vmem>>, %arg14: memref<8x784xbf16, #tpu.memory_space<vmem>>) attributes {dimension_semantics = [#tpu.dimension_semantics<parallel>], iteration_bounds = array<i64: 1>, scalar_prefetch = 0 : i64, scratch_operands = 0 : i64, tpu.core_type = #tpu.core_type<tc>, window_params = [{transform_indices = @transform_0, window_bounds = array<i64: 8, 784>}, {pipeline_mode = #tpu.pipeline_mode<synchronous>, transform_indices = @transform_1, window_bounds = array<i64: 784, 256>}, {pipeline_mode = #tpu.pipeline_mode<synchronous>, transform_indices = @transform_2, window_bounds = array<i64: 1, 256>}, {pipeline_mode = #tpu.pipeline_mode<synchronous>, transform_indices = @transform_3, window_bounds = array<i64: 256, 32>}, {pipeline_mode = #tpu.pipeline_mode<synchronous>, transform_indices = @transform_4, window_bounds = array<i64: 1, 32>}, {pipeline_mode = #tpu.pipeline_mode<synchronous>, transform_indices = @transform_5, window_bounds = array<i64: 32, 10>}, {pipeline_mode = #tpu.pipeline_mode<synchronous>, transform_indices = @transform_6, window_bounds = array<i64: 1, 10>}, {pipeline_mode = #tpu.pipeline_mode<synchronous>, transform_indices = @transform_7, window_bounds = array<i64: 10, 32>}, {pipeline_mode = #tpu.pipeline_mode<synchronous>, transform_indices = @transform_8, window_bounds = array<i64: 1, 32>}, {pipeline_mode = #tpu.pipeline_mode<synchronous>, transform_indices = @transform_9, window_bounds = array<i64: 32, 256>}, {pipeline_mode = #tpu.pipeline_mode<synchronous>, transform_indices = @transform_10, window_bounds = array<i64: 1, 256>}, {pipeline_mode = #tpu.pipeline_mode<synchronous>, transform_indices = @transform_11, window_bounds = array<i64: 256, 784>}, {pipeline_mode = #tpu.pipeline_mode<synchronous>, transform_indices = @transform_12, window_bounds = array<i64: 1, 784>}, {transform_indices = @transform_13, window_bounds = array<i64: 8, 784>}]} {
    %c0 = arith.constant 0 : index
    %c0_0 = arith.constant 0 : index
    %0 = vector.load %arg1[%c0, %c0_0] : memref<8x784xf32, #tpu.memory_space<vmem>>, vector<8x784xf32>
    %1 = arith.truncf %0 : vector<8x784xf32> to vector<8x784xbf16>
    %c0_1 = arith.constant 0 : index
    %c0_2 = arith.constant 0 : index
    %2 = vector.load %arg2[%c0_1, %c0_2] : memref<784x256xbf16, #tpu.memory_space<vmem>>, vector<784x256xbf16>
    %cst = arith.constant dense<0.000000e+00> : vector<8x256xf32>
    %3 = tpu.matmul %1, %2, %cst {dimension_numbers = #tpu.dot_dimension_numbers<[1], [0], [0], [1], [0, 0, 1, 1], [], []>} : vector<8x784xbf16>, vector<784x256xbf16>, vector<8x256xf32> -> vector<8x256xf32>
    %c0_3 = arith.constant 0 : index
    %c0_4 = arith.constant 0 : index
    %4 = vector.load %arg3[%c0_3, %c0_4] : memref<1x256xf32, #tpu.memory_space<vmem>>, vector<1x256xf32>
    %5 = vector.broadcast %4 : vector<1x256xf32> to vector<8x256xf32>
    %6 = arith.addf %3, %5 : vector<8x256xf32>
    %cst_5 = arith.constant 0.000000e+00 : f32
    %7 = vector.broadcast %cst_5 : f32 to vector<8x256xf32>
    %8 = arith.maximumf %6, %7 : vector<8x256xf32>
    %9 = arith.truncf %8 : vector<8x256xf32> to vector<8x256xbf16>
    %c0_6 = arith.constant 0 : index
    %c0_7 = arith.constant 0 : index
    %10 = vector.load %arg4[%c0_6, %c0_7] : memref<256x32xbf16, #tpu.memory_space<vmem>>, vector<256x32xbf16>
    %cst_8 = arith.constant dense<0.000000e+00> : vector<8x32xf32>
    %11 = tpu.matmul %9, %10, %cst_8 {dimension_numbers = #tpu.dot_dimension_numbers<[1], [0], [0], [1], [0, 0, 1, 1], [], []>} : vector<8x256xbf16>, vector<256x32xbf16>, vector<8x32xf32> -> vector<8x32xf32>
    %c0_9 = arith.constant 0 : index
    %c0_10 = arith.constant 0 : index
    %12 = vector.load %arg5[%c0_9, %c0_10] : memref<1x32xf32, #tpu.memory_space<vmem>>, vector<1x32xf32>
    %13 = vector.broadcast %12 : vector<1x32xf32> to vector<8x32xf32>
    %14 = arith.addf %11, %13 : vector<8x32xf32>
    %cst_11 = arith.constant 0.000000e+00 : f32
    %15 = vector.broadcast %cst_11 : f32 to vector<8x32xf32>
    %16 = arith.maximumf %14, %15 : vector<8x32xf32>
    %17 = arith.truncf %16 : vector<8x32xf32> to vector<8x32xbf16>
    %c0_12 = arith.constant 0 : index
    %c0_13 = arith.constant 0 : index
    %18 = vector.load %arg6[%c0_12, %c0_13] : memref<32x10xbf16, #tpu.memory_space<vmem>>, vector<32x10xbf16>
    %cst_14 = arith.constant dense<0.000000e+00> : vector<8x10xf32>
    %19 = tpu.matmul %17, %18, %cst_14 {dimension_numbers = #tpu.dot_dimension_numbers<[1], [0], [0], [1], [0, 0, 1, 1], [], []>} : vector<8x32xbf16>, vector<32x10xbf16>, vector<8x10xf32> -> vector<8x10xf32>
    %c0_15 = arith.constant 0 : index
    %c0_16 = arith.constant 0 : index
    %20 = vector.load %arg7[%c0_15, %c0_16] : memref<1x10xf32, #tpu.memory_space<vmem>>, vector<1x10xf32>
    %21 = vector.broadcast %20 : vector<1x10xf32> to vector<8x10xf32>
    %22 = arith.addf %19, %21 : vector<8x10xf32>
    %cst_17 = arith.constant 0.000000e+00 : f32
    %23 = vector.broadcast %cst_17 : f32 to vector<8x10xf32>
    %24 = arith.maximumf %22, %23 : vector<8x10xf32>
    %25 = arith.truncf %24 : vector<8x10xf32> to vector<8x10xbf16>
    %c0_18 = arith.constant 0 : index
    %c0_19 = arith.constant 0 : index
    %26 = vector.load %arg8[%c0_18, %c0_19] : memref<10x32xbf16, #tpu.memory_space<vmem>>, vector<10x32xbf16>
    %cst_20 = arith.constant dense<0.000000e+00> : vector<8x32xf32>
    %27 = tpu.matmul %25, %26, %cst_20 {dimension_numbers = #tpu.dot_dimension_numbers<[1], [0], [0], [1], [0, 0, 1, 1], [], []>} : vector<8x10xbf16>, vector<10x32xbf16>, vector<8x32xf32> -> vector<8x32xf32>
    %c0_21 = arith.constant 0 : index
    %c0_22 = arith.constant 0 : index
    %28 = vector.load %arg9[%c0_21, %c0_22] : memref<1x32xf32, #tpu.memory_space<vmem>>, vector<1x32xf32>
    %29 = vector.broadcast %28 : vector<1x32xf32> to vector<8x32xf32>
    %30 = arith.addf %27, %29 : vector<8x32xf32>
    %cst_23 = arith.constant 0.000000e+00 : f32
    %31 = vector.broadcast %cst_23 : f32 to vector<8x32xf32>
    %32 = arith.maximumf %30, %31 : vector<8x32xf32>
    %33 = arith.truncf %32 : vector<8x32xf32> to vector<8x32xbf16>
    %c0_24 = arith.constant 0 : index
    %c0_25 = arith.constant 0 : index
    %34 = vector.load %arg10[%c0_24, %c0_25] : memref<32x256xbf16, #tpu.memory_space<vmem>>, vector<32x256xbf16>
    %cst_26 = arith.constant dense<0.000000e+00> : vector<8x256xf32>
    %35 = tpu.matmul %33, %34, %cst_26 {dimension_numbers = #tpu.dot_dimension_numbers<[1], [0], [0], [1], [0, 0, 1, 1], [], []>} : vector<8x32xbf16>, vector<32x256xbf16>, vector<8x256xf32> -> vector<8x256xf32>
    %c0_27 = arith.constant 0 : index
    %c0_28 = arith.constant 0 : index
    %36 = vector.load %arg11[%c0_27, %c0_28] : memref<1x256xf32, #tpu.memory_space<vmem>>, vector<1x256xf32>
    %37 = vector.broadcast %36 : vector<1x256xf32> to vector<8x256xf32>
    %38 = arith.addf %35, %37 : vector<8x256xf32>
    %cst_29 = arith.constant 0.000000e+00 : f32
    %39 = vector.broadcast %cst_29 : f32 to vector<8x256xf32>
    %40 = arith.maximumf %38, %39 : vector<8x256xf32>
    %41 = arith.truncf %40 : vector<8x256xf32> to vector<8x256xbf16>
    %c0_30 = arith.constant 0 : index
    %c0_31 = arith.constant 0 : index
    %42 = vector.load %arg12[%c0_30, %c0_31] : memref<256x784xbf16, #tpu.memory_space<vmem>>, vector<256x784xbf16>
    %cst_32 = arith.constant dense<0.000000e+00> : vector<8x784xf32>
    %43 = tpu.matmul %41, %42, %cst_32 {dimension_numbers = #tpu.dot_dimension_numbers<[1], [0], [0], [1], [0, 0, 1, 1], [], []>} : vector<8x256xbf16>, vector<256x784xbf16>, vector<8x784xf32> -> vector<8x784xf32>
    %c0_33 = arith.constant 0 : index
    %c0_34 = arith.constant 0 : index
    %44 = vector.load %arg13[%c0_33, %c0_34] : memref<1x784xf32, #tpu.memory_space<vmem>>, vector<1x784xf32>
    %45 = vector.broadcast %44 : vector<1x784xf32> to vector<8x784xf32>
    %46 = arith.addf %43, %45 : vector<8x784xf32>
    %cst_35 = arith.constant 0.000000e+00 : f32
    %47 = vector.broadcast %cst_35 : f32 to vector<8x784xf32>
    %48 = arith.subf %47, %46 : vector<8x784xf32>
    %49 = math.exp %48 : vector<8x784xf32>
    %cst_36 = arith.constant 1.000000e+00 : f32
    %50 = vector.broadcast %cst_36 : f32 to vector<8x784xf32>
    %51 = arith.addf %50, %49 : vector<8x784xf32>
    %52 = tpu.reciprocal %51 {approx = true} : vector<8x784xf32> -> vector<8x784xf32>
    %53 = arith.truncf %52 : vector<8x784xf32> to vector<8x784xbf16>
    %c0_37 = arith.constant 0 : index
    %c0_38 = arith.constant 0 : index
    %54 = vector.load %arg14[%c0_37, %c0_38] : memref<8x784xbf16, #tpu.memory_space<vmem>>, vector<8x784xbf16>
    tpu.vector_store %arg14[%c0_37, %c0_38], %53 {strides = array<i32>} : memref<8x784xbf16, #tpu.memory_space<vmem>>, vector<8x784xbf16>,
    return
  }
  func.func @transform_0(%arg0: i32) -> (i32, i32) {
    %c0_i32 = arith.constant 0 : i32
    %c0_i32_0 = arith.constant 0 : i32
    return %arg0, %c0_i32 : i32, i32
  }
  func.func @transform_1(%arg0: i32) -> (i32, i32) {
    %c0_i32 = arith.constant 0 : i32
    %c0_i32_0 = arith.constant 0 : i32
    %c0_i32_1 = arith.constant 0 : i32
    return %c0_i32, %c0_i32_0 : i32, i32
  }
  func.func @transform_2(%arg0: i32) -> (i32, i32) {
    %c0_i32 = arith.constant 0 : i32
    %c0_i32_0 = arith.constant 0 : i32
    %c0_i32_1 = arith.constant 0 : i32
    return %c0_i32, %c0_i32_0 : i32, i32
  }
  func.func @transform_3(%arg0: i32) -> (i32, i32) {
    %c0_i32 = arith.constant 0 : i32
    %c0_i32_0 = arith.constant 0 : i32
    %c0_i32_1 = arith.constant 0 : i32
    return %c0_i32, %c0_i32_0 : i32, i32
  }
  func.func @transform_4(%arg0: i32) -> (i32, i32) {
    %c0_i32 = arith.constant 0 : i32
    %c0_i32_0 = arith.constant 0 : i32
    %c0_i32_1 = arith.constant 0 : i32
    return %c0_i32, %c0_i32_0 : i32, i32
  }
  func.func @transform_5(%arg0: i32) -> (i32, i32) {
    %c0_i32 = arith.constant 0 : i32
    %c0_i32_0 = arith.constant 0 : i32
    %c0_i32_1 = arith.constant 0 : i32
    return %c0_i32, %c0_i32_0 : i32, i32
  }
  func.func @transform_6(%arg0: i32) -> (i32, i32) {
    %c0_i32 = arith.constant 0 : i32
    %c0_i32_0 = arith.constant 0 : i32
    %c0_i32_1 = arith.constant 0 : i32
    return %c0_i32, %c0_i32_0 : i32, i32
  }
  func.func @transform_7(%arg0: i32) -> (i32, i32) {
    %c0_i32 = arith.constant 0 : i32
    %c0_i32_0 = arith.constant 0 : i32
    %c0_i32_1 = arith.constant 0 : i32
    return %c0_i32, %c0_i32_0 : i32, i32
  }
  func.func @transform_8(%arg0: i32) -> (i32, i32) {
    %c0_i32 = arith.constant 0 : i32
    %c0_i32_0 = arith.constant 0 : i32
    %c0_i32_1 = arith.constant 0 : i32
    return %c0_i32, %c0_i32_0 : i32, i32
  }
  func.func @transform_9(%arg0: i32) -> (i32, i32) {
    %c0_i32 = arith.constant 0 : i32
    %c0_i32_0 = arith.constant 0 : i32
    %c0_i32_1 = arith.constant 0 : i32
    return %c0_i32, %c0_i32_0 : i32, i32
  }
  func.func @transform_10(%arg0: i32) -> (i32, i32) {
    %c0_i32 = arith.constant 0 : i32
    %c0_i32_0 = arith.constant 0 : i32
    %c0_i32_1 = arith.constant 0 : i32
    return %c0_i32, %c0_i32_0 : i32, i32
  }
  func.func @transform_11(%arg0: i32) -> (i32, i32) {
    %c0_i32 = arith.constant 0 : i32
    %c0_i32_0 = arith.constant 0 : i32
    %c0_i32_1 = arith.constant 0 : i32
    return %c0_i32, %c0_i32_0 : i32, i32
  }
  func.func @transform_12(%arg0: i32) -> (i32, i32) {
    %c0_i32 = arith.constant 0 : i32
    %c0_i32_0 = arith.constant 0 : i32
    %c0_i32_1 = arith.constant 0 : i32
    return %c0_i32, %c0_i32_0 : i32, i32
  }
  func.func @transform_13(%arg0: i32) -> (i32, i32) {
    %c0_i32 = arith.constant 0 : i32
    %c0_i32_0 = arith.constant 0 : i32
    return %arg0, %c0_i32 : i32, i32
  }
}

</mosaic_0001>

<bundles_post_ra>
// kernel: autoencoder_forward.1
= control target key start
LH: loop header
LB: loop body
LE: loop exit
PB: predicated region body
PF: predicated region fallthrough
CT: control target
= control target key end

     0   :  { %vm654_vm0 = vcmask 130048   ;;  %s4848_s0 = inlined_call_operand.vmem [shape: f32[8,784], index: 0, kind: input, shape index: {}]   ;;  %s4849_s1 = inlined_call_operand.vmem [shape: bf16[784,256], index: 1, kind: input, shape index: {}]   ;;  %s4850_s2 = inlined_call_operand.vmem [shape: f32[1,256], index: 2, kind: input, shape index: {}]   ;;  %s4851_s3 = inlined_call_operand.vmem [shape: bf16[256,32], index: 3, kind: input, shape index: {}]   ;;  %s4852_s4 = inlined_call_operand.vmem [shape: f32[1,32], index: 4, kind: input, shape index: {}]   ;;  %s4853_s5 = inlined_call_operand.vmem [shape: bf16[32,10], index: 5, kind: input, shape index: {}]   ;;  %s4854_s6 = inlined_call_operand.vmem [shape: f32[1,10], index: 6, kind: input, shape index: {}]   ;;  %s4855_s7 = inlined_call_operand.vmem [shape: bf16[10,32], index: 7, kind: input, shape index: {}]   ;;  %s4856_s8 = inlined_call_operand.vmem [shape: f32[1,32], index: 8, kind: input, shape index: {}]   ;;  %s4857_s9 = inlined_call_operand.vmem [shape: bf16[32,256], index: 9, kind: input, shape index: {}]   ;;  %s4858_s10 = inlined_call_operand.vmem [shape: f32[1,256], index: 10, kind: input, shape index: {}]   ;;  %s4859_s11 = inlined_call_operand.vmem [shape: bf16[256,784], index: 11, kind: input, shape index: {}]   ;;  %s4860_s12 = inlined_call_operand.vmem [shape: f32[1,784], index: 12, kind: input, shape index: {}]   ;;  %s4861_s13 = inlined_call_operand.hbm [shape: bf16[8,784], index: 13, kind: output, shape index: {}]  }
   0x1   :  { %v2160_v0 = vld [vmem:[%s4849_s1 + $0x70] sm:$0xf]  ;;  %v3055_v1 = vld [vmem:[%s4849_s1 + $0x74] sm:$0xf0]  ;;  %v2152_v11 = vld [vmem:[%s4849_s1 + $0x60] sm:$0xf] }
   0x2   :  { %v2288_v2 = vld [vmem:[%s4849_s1 + $0x170] sm:$0xf]  ;;  %v2161_v3 = vor.u32 %v3055_v1, %v2160_v0  ;;  %v3087_v4 = vld [vmem:[%s4849_s1 + $0x174] sm:$0xf0]  ;;  %v3053_v13 = vld [vmem:[%s4849_s1 + $0x64] sm:$0xf0] }
   0x3   :  { %v2352_v5 = vld [vmem:[%s4849_s1 + $0x1f0] sm:$0xf]  ;;  %v3103_v6 = vld [vmem:[%s4849_s1 + $0x1f4] sm:$0xf0]  ;;  %v2289_v7 = vor.u32 %v3087_v4, %v2288_v2  ;;  %v2280_v14 = vld [vmem:[%s4849_s1 + $0x160] sm:$0xf]  ;;  %v2153_v16 = vor.u32 %v3053_v13, %v2152_v11 }
   0x4   :  { %v2353_v8 = vor.u32 %v3103_v6, %v2352_v5  ;;  %v2224_v9 = vld [vmem:[%s4849_s1 + $0xf0] sm:$0xf]  ;;  %v3071_v10 = vld [vmem:[%s4849_s1 + $0xf4] sm:$0xf0]  ;;  %658 = vmatpush.bf16.msra.mxu0 %v2161_v3  ;;  %v3085_v15 = vld [vmem:[%s4849_s1 + $0x164] sm:$0xf0] }
   0x5   :  { %v2225_v12 = vor.u32 %v3071_v10, %v2224_v9  ;;  %684 = vmatpush.bf16.msra.mxu2 %v2289_v7  ;;  %v2281_v17 = vor.u32 %v3085_v15, %v2280_v14  ;;  %v2344_v18 = vld [vmem:[%s4849_s1 + $0x1e0] sm:$0xf]  ;;  %v3101_v19 = vld [vmem:[%s4849_s1 + $0x1e4] sm:$0xf0]  ;;  %v2144_v23 = vld [vmem:[%s4849_s1 + $0x50] sm:$0xf] }
   0x6   :  { %697 = vmatpush.bf16.msra.mxu3 %v2353_v8  ;;  %v2216_v20 = vld [vmem:[%s4849_s1 + $0xe0] sm:$0xf]  ;;  %v2345_v21 = vor.u32 %v3101_v19, %v2344_v18  ;;  %v3069_v22 = vld [vmem:[%s4849_s1 + $0xe4] sm:$0xf0]  ;;  %v3051_v24 = vld [vmem:[%s4849_s1 + $0x54] sm:$0xf0] }
   0x7   :  { %671 = vmatpush.bf16.msra.mxu1 %v2225_v12  ;;  %v2217_v25 = vor.u32 %v3069_v22, %v2216_v20  ;;  %v2272_v26 = vld [vmem:[%s4849_s1 + $0x150] sm:$0xf]  ;;  %v3083_v27 = vld [vmem:[%s4849_s1 + $0x154] sm:$0xf0]  ;;  %v2145_v29 = vor.u32 %v3051_v24, %v2144_v23  ;;  %v2136_v35 = vld [vmem:[%s4849_s1 + $0x40] sm:$0xf] }
   0x8   :  { %v2336_v28 = vld [vmem:[%s4849_s1 + $0x1d0] sm:$0xf]  ;;  %659 = vmatpush.bf16.msra.mxu0 %v2153_v16  ;;  %v3099_v30 = vld [vmem:[%s4849_s1 + $0x1d4] sm:$0xf0]  ;;  %v2273_v33 = vor.u32 %v3083_v27, %v2272_v26  ;;  %v3049_v36 = vld [vmem:[%s4849_s1 + $0x44] sm:$0xf0] }
   0x9   :  { %v2208_v31 = vld [vmem:[%s4849_s1 + $0xd0] sm:$0xf]  ;;  %v3067_v32 = vld [vmem:[%s4849_s1 + $0xd4] sm:$0xf0]  ;;  %685 = vmatpush.bf16.msra.mxu2 %v2281_v17  ;;  %v2337_v34 = vor.u32 %v3099_v30, %v2336_v28  ;;  %v2264_v37 = vld [vmem:[%s4849_s1 + $0x140] sm:$0xf]  ;;  %v2137_v44 = vor.u32 %v3049_v36, %v2136_v35 }
   0xa   :  { %698 = vmatpush.bf16.msra.mxu3 %v2345_v21  ;;  %v2209_v38 = vor.u32 %v3067_v32, %v2208_v31  ;;  %v3081_v39 = vld [vmem:[%s4849_s1 + $0x144] sm:$0xf0]  ;;  %v2328_v40 = vld [vmem:[%s4849_s1 + $0x1c0] sm:$0xf]  ;;  %v2128_v47 = vld [vmem:[%s4849_s1 + $0x30] sm:$0xf] }
   0xb   :  { %672 = vmatpush.bf16.msra.mxu1 %v2217_v25  ;;  %v3097_v41 = vld [vmem:[%s4849_s1 + $0x1c4] sm:$0xf0]  ;;  %v2200_v42 = vld [vmem:[%s4849_s1 + $0xc0] sm:$0xf]  ;;  %v2265_v45 = vor.u32 %v3081_v39, %v2264_v37  ;;  %v3047_v48 = vld [vmem:[%s4849_s1 + $0x34] sm:$0xf0] }
   0xc   :  { %v3065_v43 = vld [vmem:[%s4849_s1 + $0xc4] sm:$0xf0]  ;;  %660 = vmatpush.bf16.msra.mxu0 %v2145_v29  ;;  %v2329_v46 = vor.u32 %v3097_v41, %v2328_v40  ;;  %v2256_v49 = vld [vmem:[%s4849_s1 + $0x130] sm:$0xf]  ;;  %v3079_v51 = vld [vmem:[%s4849_s1 + $0x134] sm:$0xf0]  ;;  %v2129_v56 = vor.u32 %v3047_v48, %v2128_v47 }
   0xd   :  { %686 = vmatpush.bf16.msra.mxu2 %v2273_v33  ;;  %v2201_v50 = vor.u32 %v3065_v43, %v2200_v42  ;;  %v2320_v52 = vld [vmem:[%s4849_s1 + $0x1b0] sm:$0xf]  ;;  %v3095_v53 = vld [vmem:[%s4849_s1 + $0x1b4] sm:$0xf0]  ;;  %v2257_v57 = vor.u32 %v3079_v51, %v2256_v49  ;;  %v2120_v59 = vld [vmem:[%s4849_s1 + $0x20] sm:$0xf] }
   0xe   :  { %699 = vmatpush.bf16.msra.mxu3 %v2337_v34  ;;  %v2192_v54 = vld [vmem:[%s4849_s1 + $0xb0] sm:$0xf]  ;;  %v3063_v55 = vld [vmem:[%s4849_s1 + $0xb4] sm:$0xf0]  ;;  %v2321_v58 = vor.u32 %v3095_v53, %v2320_v52  ;;  %v3045_v60 = vld [vmem:[%s4849_s1 + $0x24] sm:$0xf0] }
   0xf   :  { %673 = vmatpush.bf16.msra.mxu1 %v2209_v38  ;;  %v2248_v61 = vld [vmem:[%s4849_s1 + $0x120] sm:$0xf]  ;;  %v2193_v62 = vor.u32 %v3063_v55, %v2192_v54  ;;  %v3077_v63 = vld [vmem:[%s4849_s1 + $0x124] sm:$0xf0]  ;;  %v2121_v4 = vor.u32 %v3045_v60, %v2120_v59  ;;  %v2112_v7 = vld [vmem:[%s4849_s1 + $0x10] sm:$0xf] }
  0x10   :  { %661 = vmatpush.bf16.msra.mxu0 %v2137_v44  ;;  %v2312_v0 = vld [vmem:[%s4849_s1 + $0x1a0] sm:$0xf]  ;;  %v3093_v1 = vld [vmem:[%s4849_s1 + $0x1a4] sm:$0xf0]  ;;  %v2249_v5 = vor.u32 %v3077_v63, %v2248_v61  ;;  %v3043_v8 = vld [vmem:[%s4849_s1 + $0x14] sm:$0xf0] }
  0x11   :  { %687 = vmatpush.bf16.msra.mxu2 %v2265_v45  ;;  %v2184_v2 = vld [vmem:[%s4849_s1 + $0xa0] sm:$0xf]  ;;  %v3061_v3 = vld [vmem:[%s4849_s1 + $0xa4] sm:$0xf0]  ;;  %v2313_v6 = vor.u32 %v3093_v1, %v2312_v0  ;;  %v2240_v9 = vld [vmem:[%s4849_s1 + $0x110] sm:$0xf]  ;;  %v2113_v16 = vor.u32 %v3043_v8, %v2112_v7 }
  0x12   :  { %700 = vmatpush.bf16.msra.mxu3 %v2329_v46  ;;  %v2185_v10 = vor.u32 %v3061_v3, %v2184_v2  ;;  %v3075_v11 = vld [vmem:[%s4849_s1 + $0x114] sm:$0xf0]  ;;  %v2304_v12 = vld [vmem:[%s4849_s1 + $0x190] sm:$0xf]  ;;  %v2104_v17 = vld [vmem:[%s4849_s1] sm:$0xf] }
  0x13   :  { %674 = vmatpush.bf16.msra.mxu1 %v2201_v50  ;;  %v3091_v13 = vld [vmem:[%s4849_s1 + $0x194] sm:$0xf0]  ;;  %v2176_v14 = vld [vmem:[%s4849_s1 + $0x90] sm:$0xf]  ;;  %v3041_v18 = vld [vmem:[%s4849_s1 + $0x4] sm:$0xf0]  ;;  %v2241_v20 = vor.u32 %v3075_v11, %v2240_v9 }
  0x14   :  { %662 = vmatpush.bf16.msra.mxu0 %v2129_v56  ;;  %v3059_v15 = vld [vmem:[%s4849_s1 + $0x94] sm:$0xf0]  ;;  %v2232_v19 = vld [vmem:[%s4849_s1 + $0x100] sm:$0xf]  ;;  %v2305_v21 = vor.u32 %v3091_v13, %v2304_v12  ;;  %v3073_v22 = vld [vmem:[%s4849_s1 + $0x104] sm:$0xf0]  ;;  %v2105_v32 = vor.u32 %v3041_v18, %v2104_v17 }
  0x15   :  { %688 = vmatpush.bf16.msra.mxu2 %v2257_v57  ;;  %v2296_v23 = vld [vmem:[%s4849_s1 + $0x180] sm:$0xf]  ;;  %v3089_v24 = vld [vmem:[%s4849_s1 + $0x184] sm:$0xf0]  ;;  %v2177_v25 = vor.u32 %v3059_v15, %v2176_v14  ;;  %v2416_v26 = vld [vmem:[%s4849_s1 + $0x270] sm:$0xf]  ;;  %v2233_v36 = vor.u32 %v3073_v22, %v2232_v19 }
  0x16   :  { %701 = vmatpush.bf16.msra.mxu3 %v2321_v58  ;;  %v3119_v27 = vld [vmem:[%s4849_s1 + $0x274] sm:$0xf0]  ;;  %v3054_v28 = vld [vmem:[%s4849_s1 + $0x74] sm:$0xf]  ;;  %v2162_v29 = vld [vmem:[%s4849_s1 + $0x78] sm:$0xf0]  ;;  %v2297_v37 = vor.u32 %v3089_v24, %v2296_v23 }
  0x17   :  { %675 = vmatpush.bf16.msra.mxu1 %v2193_v62  ;;  %v2168_v30 = vld [vmem:[%s4849_s1 + $0x80] sm:$0xf]  ;;  %v3057_v31 = vld [vmem:[%s4849_s1 + $0x84] sm:$0xf0]  ;;  %v48_v33 = vld [vmem:[%s4848_s0 + $0x10] sm:$0xff]  ;;  %v2417_v41 = vor.u32 %v3119_v27, %v2416_v26  ;;  %v2165_v42 = vor.u32 %v3054_v28, %v2162_v29 }
  0x18   :  { %663 = vmatpush.bf16.msra.mxu0 %v2121_v4  ;;  %v2488_v34 = vld [vmem:[%s4849_s1 + $0x300] sm:$0xf]  ;;  %v3137_v35 = vld [vmem:[%s4849_s1 + $0x304] sm:$0xf0]  ;;  %v2480_v38 = vld [vmem:[%s4849_s1 + $0x2f0] sm:$0xf]  ;;  %v2169_v46 = vor.u32 %v3057_v31, %v2168_v30  ;;  %v3642_v51 = vpack.c.bf16 %v48_v33, %v48_v33 }
  0x19   :  { %689 = vmatpush.bf16.msra.mxu2 %v2249_v5  ;;  %v3135_v39 = vld [vmem:[%s4849_s1 + $0x2f4] sm:$0xf0]  ;;  %v3070_v40 = vld [vmem:[%s4849_s1 + $0xf4] sm:$0xf]  ;;  %v2226_v43 = vld [vmem:[%s4849_s1 + $0xf8] sm:$0xf0]  ;;  %v2489_v47 = vor.u32 %v3137_v35, %v2488_v34 }
  0x1a   :  { %702 = vmatpush.bf16.msra.mxu3 %v2313_v6  ;;  %v2408_v44 = vld [vmem:[%s4849_s1 + $0x260] sm:$0xf]  ;;  %v3117_v48 = vld [vmem:[%s4849_s1 + $0x264] sm:$0xf0]  ;;  %v3052_v49 = vld [vmem:[%s4849_s1 + $0x64] sm:$0xf]  ;;  %v2481_v52 = vor.u32 %v3135_v39, %v2480_v38  ;;  %v2229_v55 = vor.u32 %v3070_v40, %v2226_v43 }
  0x1b   :  { %676 = vmatpush.bf16.msra.mxu1 %v2185_v10  ;;  %v46_v45 = vld [vmem:[%s4848_s0] sm:$0xff]  ;;  %v2154_v50 = vld [vmem:[%s4849_s1 + $0x68] sm:$0xf0]  ;;  %v49_v53 = vld [vmem:[%s4848_s0 + $0x18] sm:$0xff]  ;;  %v2409_v59 = vor.u32 %v3117_v48, %v2408_v44 }
  0x1c   :  { %664 = vmatpush.bf16.msra.mxu0 %v2113_v16  ;;  %v47_v54 = vld [vmem:[%s4848_s0 + $0x8] sm:$0xff]  ;;  %v2472_v56 = vld [vmem:[%s4849_s1 + $0x2e0] sm:$0xf]  ;;  %v3656_v58 = vpack.c.bf16 %v46_v45, %v46_v45  ;;  %v2157_v60 = vor.u32 %v3052_v49, %v2154_v50  ;;  %v3068_v61 = vld [vmem:[%s4849_s1 + $0xe4] sm:$0xf]  ;;  %v3676_v3 = vpack.c.bf16 %v49_v53, %v49_v53 }
  0x1d   :  { %690 = vmatpush.bf16.msra.mxu2 %v2241_v20  ;;  %v3133_v57 = vld [vmem:[%s4849_s1 + $0x2e4] sm:$0xf0]  ;;  %v2218_v62 = vld [vmem:[%s4849_s1 + $0xe8] sm:$0xf0]  ;;  %v2400_v63 = vld [vmem:[%s4849_s1 + $0x250] sm:$0xf]  ;;  %v3678_v4 = vpack.c.bf16 %v47_v54, %v47_v54 }
  0x1e   :  { %703 = vmatpush.bf16.msra.mxu3 %v2305_v21  ;;  %v3115_v0 = vld [vmem:[%s4849_s1 + $0x254] sm:$0xf0]  ;;  %v3050_v1 = vld [vmem:[%s4849_s1 + $0x54] sm:$0xf]  ;;  %v2146_v2 = vld [vmem:[%s4849_s1 + $0x58] sm:$0xf0]  ;;  %v2473_v5 = vor.u32 %v3133_v57, %v2472_v56  ;;  %v2221_v6 = vor.u32 %v3068_v61, %v2218_v62 }
  0x1f   :  { %677 = vmatpush.bf16.msra.mxu1 %v2177_v25  ;;  %v2464_v7 = vld [vmem:[%s4849_s1 + $0x2d0] sm:$0xf]  ;;  %v3131_v8 = vld [vmem:[%s4849_s1 + $0x2d4] sm:$0xf0]  ;;  %v2401_v9 = vor.u32 %v3115_v0, %v2400_v63  ;;  %v2149_v10 = vor.u32 %v3050_v1, %v2146_v2  ;;  %v3066_v11 = vld [vmem:[%s4849_s1 + $0xd4] sm:$0xf] }
  0x20   :  { %665 = vmatpush.bf16.msra.mxu0 %v2105_v32  ;;  %v2210_v12 = vld [vmem:[%s4849_s1 + $0xd8] sm:$0xf0]  ;;  %v2392_v13 = vld [vmem:[%s4849_s1 + $0x240] sm:$0xf]  ;;  %v3113_v14 = vld [vmem:[%s4849_s1 + $0x244] sm:$0xf0]  ;;  %v2465_v17 = vor.u32 %v3131_v8, %v2464_v7 }
  0x21   :  { %691 = vmatpush.bf16.msra.mxu2 %v2233_v36  ;;  %v3048_v15 = vld [vmem:[%s4849_s1 + $0x44] sm:$0xf]  ;;  %v2138_v16 = vld [vmem:[%s4849_s1 + $0x48] sm:$0xf0]  ;;  %v2213_v18 = vor.u32 %v3066_v11, %v2210_v12  ;;  %v2456_v19 = vld [vmem:[%s4849_s1 + $0x2c0] sm:$0xf]  ;;  %v2393_v21 = vor.u32 %v3113_v14, %v2392_v13 }
  0x22   :  { %704 = vmatpush.bf16.msra.mxu3 %v2297_v37  ;;  %v3129_v20 = vld [vmem:[%s4849_s1 + $0x2c4] sm:$0xf0]  ;;  %v2141_v22 = vor.u32 %v3048_v15, %v2138_v16  ;;  %v3064_v23 = vld [vmem:[%s4849_s1 + $0xc4] sm:$0xf]  ;;  %v2202_v24 = vld [vmem:[%s4849_s1 + $0xc8] sm:$0xf0] }
  0x23   :  { %678 = vmatpush.bf16.msra.mxu1 %v2169_v46  ;;  %666 = vmatmul.bf16.vlgmr.msra.gmra.mxu0 %v3656_v58  ;;  %v2384_v25 = vld [vmem:[%s4849_s1 + $0x230] sm:$0xf]  ;;  %v3111_v26 = vld [vmem:[%s4849_s1 + $0x234] sm:$0xf0]  ;;  %v3046_v27 = vld [vmem:[%s4849_s1 + $0x34] sm:$0xf]  ;;  %v2457_v29 = vor.u32 %v3129_v20, %v2456_v19  ;;  %v2205_v30 = vor.u32 %v3064_v23, %v2202_v24 }
  0x24   :  { %710 = vmatpush.bf16.msrb.mxu0 %v2417_v41  ;;  %692 = vmatmul.bf16.vlgmr.msra.gmra.mxu2 %v3642_v51  ;;  %v2130_v28 = vld [vmem:[%s4849_s1 + $0x38] sm:$0xf0]  ;;  %v2448_v31 = vld [vmem:[%s4849_s1 + $0x2b0] sm:$0xf]  ;;  %v3127_v32 = vld [vmem:[%s4849_s1 + $0x2b4] sm:$0xf0]  ;;  %v2385_v34 = vor.u32 %v3111_v26, %v2384_v25 }
  0x25   :  { %743 = vmatpush.bf16.msrb.mxu2 %v2489_v47  ;;  %705 = vmatmul.bf16.vlgmr.msra.gmra.mxu3 %v3676_v3  ;;  %v52_v33 = vld [vmem:[%s4848_s0 + $0x30] sm:$0xff]  ;;  %v2133_v35 = vor.u32 %v3046_v27, %v2130_v28  ;;  %v2194_v37 = vld [vmem:[%s4849_s1 + $0xb8] sm:$0xf0]  ;;  %v2376_v38 = vld [vmem:[%s4849_s1 + $0x220] sm:$0xf] }
  0x26   :  { %749 = vmatpush.bf16.msrb.mxu3 %v2165_v42  ;;  %679 = vmatmul.bf16.vlgmr.msra.gmra.mxu1 %v3678_v4  ;;  %v3062_v36 = vld [vmem:[%s4849_s1 + $0xb4] sm:$0xf]  ;;  %v3109_v39 = vld [vmem:[%s4849_s1 + $0x224] sm:$0xf0]  ;;  %v3044_v40 = vld [vmem:[%s4849_s1 + $0x24] sm:$0xf]  ;;  %v2449_v42 = vor.u32 %v3127_v32, %v2448_v31  ;;  %v3759_v43 = vpack.c.bf16 %v52_v33, %v52_v33 }
  0x27   :  { %723 = vmatpush.bf16.msrb.mxu1 %v2481_v52  ;;  %v2122_v41 = vld [vmem:[%s4849_s1 + $0x28] sm:$0xf0]  ;;  %v2197_v44 = vor.u32 %v3062_v36, %v2194_v37  ;;  %v2440_v45 = vld [vmem:[%s4849_s1 + $0x2a0] sm:$0xf]  ;;  %v3125_v46 = vld [vmem:[%s4849_s1 + $0x2a4] sm:$0xf0]  ;;  %v2377_v47 = vor.u32 %v3109_v39, %v2376_v38 }
  0x28   :  { %711 = vmatpush.bf16.msrb.mxu0 %v2409_v59  ;;  %v2125_v48 = vor.u32 %v3044_v40, %v2122_v41  ;;  %v3060_v49 = vld [vmem:[%s4849_s1 + $0xa4] sm:$0xf]  ;;  %v2186_v50 = vld [vmem:[%s4849_s1 + $0xa8] sm:$0xf0]  ;;  %v2368_v52 = vld [vmem:[%s4849_s1 + $0x210] sm:$0xf]  ;;  %v2441_v56 = vor.u32 %v3125_v46, %v2440_v45 }
  0x29   :  { %762 = vmatpush.bf16.msra.mxu2 %v2229_v55  ;;  %v3107_v53 = vld [vmem:[%s4849_s1 + $0x214] sm:$0xf0]  ;;  %v3042_v54 = vld [vmem:[%s4849_s1 + $0x14] sm:$0xf]  ;;  %v2114_v55 = vld [vmem:[%s4849_s1 + $0x18] sm:$0xf0]  ;;  %v2189_v57 = vor.u32 %v3060_v49, %v2186_v50 }
  0x2a   :  { %750 = vmatpush.bf16.msrb.mxu3 %v2157_v60  ;;  %v2432_v59 = vld [vmem:[%s4849_s1 + $0x290] sm:$0xf]  ;;  %v3123_v60 = vld [vmem:[%s4849_s1 + $0x294] sm:$0xf0]  ;;  %v3058_v61 = vld [vmem:[%s4849_s1 + $0x94] sm:$0xf]  ;;  %v2369_v62 = vor.u32 %v3107_v53, %v2368_v52  ;;  %v2117_v63 = vor.u32 %v3042_v54, %v2114_v55 }
  0x2b   :  { %724 = vmatpush.bf16.msrb.mxu1 %v2473_v5  ;;  %v2178_v0 = vld [vmem:[%s4849_s1 + $0x98] sm:$0xf0]  ;;  %v2360_v1 = vld [vmem:[%s4849_s1 + $0x200] sm:$0xf]  ;;  %v3105_v2 = vld [vmem:[%s4849_s1 + $0x204] sm:$0xf0]  ;;  %v2433_v8 = vor.u32 %v3123_v60, %v2432_v59 }
  0x2c   :  { %712 = vmatpush.bf16.msrb.mxu0 %v2401_v9  ;;  %v3040_v5 = vld [vmem:[%s4849_s1 + $0x4] sm:$0xf]  ;;  %v3086_v7 = vld [vmem:[%s4849_s1 + $0x174] sm:$0xf]  ;;  %v2290_v9 = vld [vmem:[%s4849_s1 + $0x178] sm:$0xf0]  ;;  %v2181_v12 = vor.u32 %v3058_v61, %v2178_v0  ;;  %v2361_v16 = vor.u32 %v3105_v2, %v2360_v1 }
  0x2d   :  { %763 = vmatpush.bf16.msra.mxu2 %v2221_v6  ;;  %v2106_v6 = vld [vmem:[%s4849_s1 + $0x8] sm:$0xf0]  ;;  %v2418_v11 = vld [vmem:[%s4849_s1 + $0x278] sm:$0xf0]  ;;  %v2424_v13 = vld [vmem:[%s4849_s1 + $0x280] sm:$0xf] }
  0x2e   :  { %751 = vmatpush.bf16.msrb.mxu3 %v2149_v10  ;;  %v3118_v10 = vld [vmem:[%s4849_s1 + $0x274] sm:$0xf]  ;;  %v3121_v14 = vld [vmem:[%s4849_s1 + $0x284] sm:$0xf0]  ;;  %v50_v15 = vld [vmem:[%s4848_s0 + $0x20] sm:$0xff] }
  0x2f   :  { %725 = vmatpush.bf16.msrb.mxu1 %v2465_v17  ;;  %v2109_v17 = vor.u32 %v3040_v5, %v2106_v6  ;;  %v2170_v19 = vld [vmem:[%s4849_s1 + $0x88] sm:$0xf0]  ;;  %v3102_v20 = vld [vmem:[%s4849_s1 + $0x1f4] sm:$0xf]  ;;  %v2354_v23 = vld [vmem:[%s4849_s1 + $0x1f8] sm:$0xf0]  ;;  %v2425_v26 = vor.u32 %v3121_v14, %v2424_v13 }
  0x30   :  { %713 = vmatpush.bf16.msrb.mxu0 %v2393_v21  ;;  %v2293_v21 = vor.u32 %v3086_v7, %v2290_v9  ;;  %v3134_v24 = vld [vmem:[%s4849_s1 + $0x2f4] sm:$0xf]  ;;  %v2482_v25 = vld [vmem:[%s4849_s1 + $0x2f8] sm:$0xf0]  ;;  %v51_v27 = vld [vmem:[%s4848_s0 + $0x28] sm:$0xff] }
  0x31   :  { %764 = vmatpush.bf16.msra.mxu2 %v2213_v18  ;;  %v3056_v18 = vld [vmem:[%s4849_s1 + $0x84] sm:$0xf]  ;;  %v2410_v33 = vld [vmem:[%s4849_s1 + $0x268] sm:$0xf0]  ;;  %v3870_v37 = vpack.c.bf16 %v51_v27, %v51_v27  ;;  %v2274_v45 = vld [vmem:[%s4849_s1 + $0x158] sm:$0xf0] }
  0x32   :  { %752 = vmatpush.bf16.msrb.mxu3 %v2141_v22  ;;  %v2421_v22 = vor.u32 %v3118_v10, %v2418_v11  ;;  %v3084_v28 = vld [vmem:[%s4849_s1 + $0x164] sm:$0xf]  ;;  %v2173_v31 = vor.u32 %v3056_v18, %v2170_v19  ;;  %v2346_v39 = vld [vmem:[%s4849_s1 + $0x1e8] sm:$0xf0]  ;;  %v3114_v46 = vld [vmem:[%s4849_s1 + $0x254] sm:$0xf] }
  0x33   :  { %726 = vmatpush.bf16.msrb.mxu1 %v2457_v29  ;;  %v2282_v29 = vld [vmem:[%s4849_s1 + $0x168] sm:$0xf0]  ;;  %v3116_v32 = vld [vmem:[%s4849_s1 + $0x264] sm:$0xf]  ;;  %v3098_v50 = vld [vmem:[%s4849_s1 + $0x1d4] sm:$0xf] }
  0x34   :  { %714 = vmatpush.bf16.msrb.mxu0 %v2385_v34  ;;  %2494 = vmatmul.msk.bf16.vlgmr.msrb.gmra.mxu2 %vm654_vm0, %v3759_v43  ;;  %v2357_v34 = vor.u32 %v3102_v20, %v2354_v23  ;;  %v3100_v36 = vld [vmem:[%s4849_s1 + $0x1e4] sm:$0xf]  ;;  %v2285_v38 = vor.u32 %v3084_v28, %v2282_v29  ;;  %v2474_v41 = vld [vmem:[%s4849_s1 + $0x2e8] sm:$0xf0]  ;;  %v2338_v52 = vld [vmem:[%s4849_s1 + $0x1d8] sm:$0xf0] }
  0x35   :  { %765 = vmatpush.bf16.msra.mxu2 %v2205_v30  ;;  %v3859_v30 = vpack.c.bf16 %v50_v15, %v50_v15  ;;  %v3132_v40 = vld [vmem:[%s4849_s1 + $0x2e4] sm:$0xf]  ;;  %v3130_v53 = vld [vmem:[%s4849_s1 + $0x2d4] sm:$0xf]  ;;  %v2466_v55 = vld [vmem:[%s4849_s1 + $0x2d8] sm:$0xf0] }
  0x36   :  { %753 = vmatpush.bf16.msrb.mxu3 %v2133_v35  ;;  %v2485_v35 = vor.u32 %v3134_v24, %v2482_v25  ;;  %v2477_v49 = vor.u32 %v3132_v40, %v2474_v41  ;;  %v3112_v60 = vld [vmem:[%s4849_s1 + $0x244] sm:$0xf]  ;;  %v2394_v61 = vld [vmem:[%s4849_s1 + $0x248] sm:$0xf0] }
  0x37   :  { %727 = vmatpush.bf16.msrb.mxu1 %v2449_v42  ;;  %v2413_v42 = vor.u32 %v3116_v32, %v2410_v33 }
  0x38   :  { %715 = vmatpush.bf16.msrb.mxu0 %v2377_v47  ;;  %v2402_v47 = vld [vmem:[%s4849_s1 + $0x258] sm:$0xf0] }
  0x39   :  { %766 = vmatpush.bf16.msra.mxu2 %v2197_v44  ;;  %v3082_v44 = vld [vmem:[%s4849_s1 + $0x154] sm:$0xf]  ;;  %v2405_v59 = vor.u32 %v3114_v46, %v2402_v47 }
  0x3a   :  { %754 = vmatpush.bf16.msrb.mxu3 %v2125_v48  ;;  %v2349_v48 = vor.u32 %v3100_v36, %v2346_v39  ;;  %v2277_v54 = vor.u32 %v3082_v44, %v2274_v45 }
  0x3b   :  { %728 = vmatpush.bf16.msrb.mxu1 %v2441_v56  ;;  %v3080_v56 = vld [vmem:[%s4849_s1 + $0x144] sm:$0xf] }
  0x3c   :  { %716 = vmatpush.bf16.msrb.mxu0 %v2369_v62 }
  0x3d   :  { %767 = vmatpush.bf16.msra.mxu2 %v2189_v57  ;;  %v2266_v57 = vld [vmem:[%s4849_s1 + $0x148] sm:$0xf0] }
  0x3e   :  { %755 = vmatpush.bf16.msrb.mxu3 %v2117_v63 }
  0x3f   :  { %729 = vmatpush.bf16.msrb.mxu1 %v2433_v8 }
  0x40   :  { %717 = vmatpush.bf16.msrb.mxu0 %v2361_v16 }
  0x41   :  { %768 = vmatpush.bf16.msra.mxu2 %v2181_v12 }
  0x42   :  { %756 = vmatpush.bf16.msrb.mxu3 %v2109_v17 }
  0x43   :  { %730 = vmatpush.bf16.msrb.mxu1 %v2425_v26  ;;  %718 = vmatmul.bf16.vlgmr.msrb.gmra.mxu0 %v3859_v30 }
  0x44   :  { %775 = vmatpush.bf16.msra.mxu0 %v2293_v21 }
  0x45   :  { %769 = vmatpush.bf16.msra.mxu2 %v2173_v31  ;;  %757 = vmatmul.bf16.vlgmr.msrb.gmra.mxu3 %v3656_v58 }
  0x46   :  { %801 = vmatpush.bf16.msra.mxu3 %v2421_v22  ;;  %731 = vmatmul.bf16.vlgmr.msrb.gmra.mxu1 %v3870_v37 }
  0x47   :  { %788 = vmatpush.bf16.msra.mxu1 %v2357_v34 }
  0x48   :  { %776 = vmatpush.bf16.msra.mxu0 %v2285_v38  ;;  %770 = vmatmul.bf16.vlgmr.msra.gmra.mxu2 %v3678_v4 }
  0x49   :  { %814 = vmatpush.bf16.msrb.mxu2 %v2485_v35 }
  0x4a   :  { %802 = vmatpush.bf16.msra.mxu3 %v2413_v42 }
  0x4b   :  { %18 = vsyncpa [#allocation3], 0  ;;  %789 = vmatpush.bf16.msra.mxu1 %v2349_v48  ;;  %v2341_v62 = vor.u32 %v3098_v50, %v2338_v52  ;;  %v2469_v63 = vor.u32 %v3130_v53, %v2466_v55  ;;  %v3096_v0 = vld [vmem:[%s4849_s1 + $0x1c4] sm:$0xf]  ;;  %v2269_v1 = vor.u32 %v3080_v56, %v2266_v57  ;;  %v2330_v2 = vld [vmem:[%s4849_s1 + $0x1c8] sm:$0xf0]  ;;  %v2397_v5 = vor.u32 %v3112_v60, %v2394_v61 }
  0x4c   :  { %777 = vmatpush.bf16.msra.mxu0 %v2277_v54  ;;  %v3128_v4 = vld [vmem:[%s4849_s1 + $0x2c4] sm:$0xf]  ;;  %v2458_v58 = vld [vmem:[%s4849_s1 + $0x2c8] sm:$0xf0]  ;;  %v3078_v6 = vld [vmem:[%s4849_s1 + $0x134] sm:$0xf]  ;;  %v2333_v10 = vor.u32 %v3096_v0, %v2330_v2 }
  0x4d   :  { %815 = vmatpush.bf16.msrb.mxu2 %v2477_v49  ;;  %v2258_v7 = vld [vmem:[%s4849_s1 + $0x138] sm:$0xf0]  ;;  %v3110_v8 = vld [vmem:[%s4849_s1 + $0x234] sm:$0xf]  ;;  %v2461_v11 = vor.u32 %v3128_v4, %v2458_v58  ;;  %v3076_v18 = vld [vmem:[%s4849_s1 + $0x124] sm:$0xf] }
  0x4e   :  { %803 = vmatpush.bf16.msra.mxu3 %v2405_v59  ;;  %v2386_v9 = vld [vmem:[%s4849_s1 + $0x238] sm:$0xf0]  ;;  %v3094_v12 = vld [vmem:[%s4849_s1 + $0x1b4] sm:$0xf]  ;;  %v2261_v13 = vor.u32 %v3078_v6, %v2258_v7  ;;  %v2250_v19 = vld [vmem:[%s4849_s1 + $0x128] sm:$0xf0] }
  0x4f   :  { %790 = vmatpush.bf16.msra.mxu1 %v2341_v62  ;;  %v2322_v14 = vld [vmem:[%s4849_s1 + $0x1b8] sm:$0xf0]  ;;  %v3126_v15 = vld [vmem:[%s4849_s1 + $0x2b4] sm:$0xf]  ;;  %v2389_v17 = vor.u32 %v3110_v8, %v2386_v9  ;;  %v3108_v20 = vld [vmem:[%s4849_s1 + $0x224] sm:$0xf]  ;;  %v2253_v25 = vor.u32 %v3076_v18, %v2250_v19 }
  0x50   :  { %778 = vmatpush.bf16.msra.mxu0 %v2269_v1  ;;  %v2450_v16 = vld [vmem:[%s4849_s1 + $0x2b8] sm:$0xf0]  ;;  %v2378_v21 = vld [vmem:[%s4849_s1 + $0x228] sm:$0xf0]  ;;  %v2325_v22 = vor.u32 %v3094_v12, %v2322_v14  ;;  %v3092_v24 = vld [vmem:[%s4849_s1 + $0x1a4] sm:$0xf] }
  0x51   :  { %816 = vmatpush.bf16.msrb.mxu2 %v2469_v63  ;;  %v2453_v23 = vor.u32 %v3126_v15, %v2450_v16  ;;  %v2314_v26 = vld [vmem:[%s4849_s1 + $0x1a8] sm:$0xf0]  ;;  %v3124_v27 = vld [vmem:[%s4849_s1 + $0x2a4] sm:$0xf]  ;;  %v2381_v29 = vor.u32 %v3108_v20, %v2378_v21  ;;  %v3074_v31 = vld [vmem:[%s4849_s1 + $0x114] sm:$0xf] }
  0x52   :  { %804 = vmatpush.bf16.msra.mxu3 %v2397_v5  ;;  %v2442_v28 = vld [vmem:[%s4849_s1 + $0x2a8] sm:$0xf0]  ;;  %v2242_v32 = vld [vmem:[%s4849_s1 + $0x118] sm:$0xf0]  ;;  %v3106_v33 = vld [vmem:[%s4849_s1 + $0x214] sm:$0xf]  ;;  %v2317_v35 = vor.u32 %v3092_v24, %v2314_v26 }
  0x53   :  { %791 = vmatpush.bf16.msra.mxu1 %v2333_v10  ;;  %v2370_v34 = vld [vmem:[%s4849_s1 + $0x218] sm:$0xf0]  ;;  %v2445_v36 = vor.u32 %v3124_v27, %v2442_v28  ;;  %v3090_v38 = vld [vmem:[%s4849_s1 + $0x194] sm:$0xf]  ;;  %v2245_v39 = vor.u32 %v3074_v31, %v2242_v32  ;;  %v3072_v45 = vld [vmem:[%s4849_s1 + $0x104] sm:$0xf] }
  0x54   :  { %779 = vmatpush.bf16.msra.mxu0 %v2261_v13  ;;  %v2306_v40 = vld [vmem:[%s4849_s1 + $0x198] sm:$0xf0]  ;;  %v3122_v41 = vld [vmem:[%s4849_s1 + $0x294] sm:$0xf]  ;;  %v2373_v44 = vor.u32 %v3106_v33, %v2370_v34  ;;  %v2234_v46 = vld [vmem:[%s4849_s1 + $0x108] sm:$0xf0] }
  0x55   :  { %817 = vmatpush.bf16.msrb.mxu2 %v2461_v11  ;;  %v2434_v42 = vld [vmem:[%s4849_s1 + $0x298] sm:$0xf0]  ;;  %v3104_v47 = vld [vmem:[%s4849_s1 + $0x204] sm:$0xf]  ;;  %v2362_v48 = vld [vmem:[%s4849_s1 + $0x208] sm:$0xf0]  ;;  %v2309_v52 = vor.u32 %v3090_v38, %v2306_v40  ;;  %v2237_v54 = vor.u32 %v3072_v45, %v2234_v46 }
  0x56   :  { %805 = vmatpush.bf16.msra.mxu3 %v2389_v17  ;;  %v3136_v49 = vld [vmem:[%s4849_s1 + $0x304] sm:$0xf]  ;;  %v2490_v50 = vld [vmem:[%s4849_s1 + $0x308] sm:$0xf0]  ;;  %v2437_v53 = vor.u32 %v3122_v41, %v2434_v42  ;;  %v2365_v57 = vor.u32 %v3104_v47, %v2362_v48  ;;  %v3145_v0 = vld [vmem:[%s4851_s3 + $0x38] sm:$0xff]  ;;  %vm1024_vm1 = vcmask 261120  }
  0x57   :  { %792 = vmatpush.bf16.msra.mxu1 %v2325_v22  ;;  %v3088_v55 = vld [vmem:[%s4849_s1 + $0x184] sm:$0xf]  ;;  %v2298_v56 = vld [vmem:[%s4849_s1 + $0x188] sm:$0xf0]  ;;  %v2493_v61 = vor.u32 %v3136_v49, %v2490_v50  ;;  %v3144_v1 = vld [vmem:[%s4851_s3 + $0x30] sm:$0xff]  ;;  %vm1058_vm2 = vcmask 1044480  }
  0x58   :  { %780 = vmatpush.bf16.msra.mxu0 %v2253_v25  ;;  %v3120_v59 = vld [vmem:[%s4849_s1 + $0x284] sm:$0xf]  ;;  %v2426_v60 = vld [vmem:[%s4849_s1 + $0x288] sm:$0xf0]  ;;  %v2301_v62 = vor.u32 %v3088_v55, %v2298_v56  ;;  %v158_v6 = vld [vmem:[%s4850_s2] sm:$0x3] }
  0x59   :  { %818 = vmatpush.bf16.msrb.mxu2 %v2453_v23  ;;  %v2429_v63 = vor.u32 %v3120_v59, %v2426_v60  ;;  %v3138_v58 = vld [vmem:[%s4851_s3] sm:$0xff]  ;;  %v3153_v9 = vld [vmem:[%s4851_s3 + $0x78] sm:$0xff]  ;;  %v160_v11 = vperm.slane %v158_v6, 0  ;;  %v3152_v13 = vld [vmem:[%s4851_s3 + $0x70] sm:$0xff]  ;;  %v161_v42 = vperm.slane %v158_v6, 1  ;;  %vm1054_vm3 = vcmask 80896  }
  0x5a   :  { %806 = vmatpush.bf16.msra.mxu3 %v2381_v29  ;;  %v3151_v19 = vld [vmem:[%s4851_s3 + $0x68] sm:$0xff]  ;;  %v3150_v22 = vld [vmem:[%s4851_s3 + $0x60] sm:$0xff]  ;;  %v3149_v27 = vld [vmem:[%s4851_s3 + $0x58] sm:$0xff]  ;;  %s2093_s26 = sshll.u32 %s4861_s13, 4  ;;  %vm2084_vm4 = vcmask 125952   ;;  %s2094_s26 = int_to_ptr.hbm [resolvable:$true] %s2093_s26 }
  0x5b   :  { %793 = vmatpush.bf16.msra.mxu1 %v2317_v35  ;;  %v3148_v32 = vld [vmem:[%s4851_s3 + $0x50] sm:$0xff]  ;;  %v3147_v38 = vld [vmem:[%s4851_s3 + $0x48] sm:$0xff] }
  0x5c   :  { %781 = vmatpush.bf16.msra.mxu0 %v2245_v39  ;;  %v3146_v39 = vld [vmem:[%s4851_s3 + $0x40] sm:$0xff] }
  0x5d   :  { %819 = vmatpush.bf16.msrb.mxu2 %v2445_v36 }
  0x5e   :  { %807 = vmatpush.bf16.msra.mxu3 %v2373_v44 }
  0x5f   :  { %794 = vmatpush.bf16.msra.mxu1 %v2309_v52 }
  0x60   :  { %782 = vmatpush.bf16.msra.mxu0 %v2237_v54 }
  0x61   :  { %820 = vmatpush.bf16.msrb.mxu2 %v2437_v53 }
  0x62   :  { %808 = vmatpush.bf16.msra.mxu3 %v2365_v57 }
  0x63   :  { %795 = vmatpush.bf16.msra.mxu1 %v2301_v62  ;;  %783 = vmatmul.bf16.vlgmr.msra.gmra.mxu0 %v3642_v51  ;;  %v3143_v51 = vld [vmem:[%s4851_s3 + $0x28] sm:$0xff] }
  0x64   :  { %834 = vmatpush.bf16.msrb.mxu0 %v2493_v61 }
  0x65   :  { %809 = vmatmul.bf16.vlgmr.msra.gmra.mxu3 %v3859_v30  ;;  %821 = vmatpush.bf16.msrb.mxu2 %v2429_v63  ;;  %v3140_v30 = vld [vmem:[%s4851_s3 + $0x10] sm:$0xff] }
  0x66   :  { %796 = vmatmul.bf16.vlgmr.msra.gmra.mxu1 %v3676_v3  ;;  %v3142_v3 = vld [vmem:[%s4851_s3 + $0x20] sm:$0xff]  ;;  %989 = vmatpush.bf16.msrb.mxu3 %v3153_v9 }
  0x67   :  { %976 = vmatpush.bf16.msrb.mxu1 %v3145_v0 }
  0x68   :  { %822 = vmatmul.bf16.vlgmr.msrb.gmra.mxu2 %v3870_v37  ;;  %v3139_v37 = vld [vmem:[%s4851_s3 + $0x8] sm:$0xff] }
  0x6a   :  { %990 = vmatpush.bf16.msrb.mxu3 %v3152_v13 }
  0x6b   :  { %977 = vmatpush.bf16.msrb.mxu1 %v3144_v1 }
  0x6e   :  { %991 = vmatpush.bf16.msrb.mxu3 %v3151_v19  ;;  %v3159_v19 = vld [vmem:[%s4857_s9 + $0x14] sm:$0xf] }
  0x6f   :  { %978 = vmatpush.bf16.msrb.mxu1 %v3143_v51 }
  0x72   :  { %992 = vmatpush.bf16.msrb.mxu3 %v3150_v22 }
  0x73   :  { %2495 = vmatmul.msk.bf16.vlgmr.msrb.gmra.mxu0 %vm654_vm0, %v3759_v43  ;;  %979 = vmatpush.bf16.msrb.mxu1 %v3142_v3  ;;  %v3141_v43 = vld [vmem:[%s4851_s3 + $0x18] sm:$0xff]  ;;  %v3155_v3 = vld [vmem:[%s4853_s5 + $0x8] sm:$0xff] }
  0x74   :  { %1034 = vmatpush.bf16.msra.mxu0 %v3155_v3 }
  0x76   :  { %993 = vmatpush.bf16.msrb.mxu3 %v3149_v27  ;;  %v2578_v27 = vld [vmem:[%s4857_s9 + $0x8] sm:$0xf0] }
  0x77   :  { %980 = vmatpush.bf16.msrb.mxu1 %v3141_v43  ;;  %v3154_v43 = vld [vmem:[%s4853_s5] sm:$0xff] }
  0x78   :  { %1035 = vmatpush.bf16.msra.mxu0 %v3154_v43 }
  0x7a   :  { %994 = vmatpush.bf16.msrb.mxu3 %v3148_v32  ;;  %v3014_v32 = vld [vmem:[%s4859_s11 + $0x348] sm:$0xf] }
  0x7b   :  { %981 = vmatpush.bf16.msrb.mxu1 %v3140_v30  ;;  %v3274_v30 = vld [vmem:[%s4852_s4] ss:$0 sm:$0xff] }
  0x7e   :  { %995 = vmatpush.bf16.msrb.mxu3 %v3147_v38 }
  0x7f   :  { %982 = vmatpush.bf16.msrb.mxu1 %v3139_v37 }
  0x82   :  { %996 = vmatpush.bf16.msrb.mxu3 %v3146_v39 }
  0x83   :  { %983 = vmatpush.bf16.msrb.mxu1 %v3138_v58 }
  0xa0   :  { %v667_v2 = vpop.f32.mrf.mxu0 }
  0xa1   :  { %v668_v14 = vadd.f32 %v667_v2, %v160_v11  ;;  %v3275_v11 = vld [vmem:[%s4854_s6] ss:$0 sm:$0xff] }
  0xa3   :  { %v680_v4 = vpop.f32.mrf.mxu1 }
  0xa4   :  { %v681_v16 = vadd.f32 %v680_v4, %v668_v14 }
  0xa7   :  { %v693_v5 = vpop.f32.mrf.mxu2 }
  0xa8   :  { %v706_v7 = vpop.f32.mrf.mxu3  ;;  %v669_v8 = vpop.f32.mrf.mxu0  ;;  %v694_v18 = vadd.f32 %v693_v5, %v681_v16 }
  0xa9   :  { %v3156_v8 = vld [vmem:[%s4855_s7] sm:$0x10] }
  0xaa   :  { %v707_v20 = vadd.f32 %v706_v7, %v694_v18  ;;  %v2571_v7 = vld [vmem:[%s4855_s7] sm:$0xf]  ;;  %v3160_v18 = vld [vmem:[%s4857_s9 + $0x14] sm:$0xf0] }
  0xab   :  { %v682_v10 = vpop.f32.mrf.mxu1  ;;  %v2572_v9 = vor.u32 %v3156_v8, %v2571_v7  ;;  %v3245_v7 = vld [vmem:[%s4859_s11 + $0x2a4] sm:$0xf]  ;;  %v2932_v8 = vld [vmem:[%s4859_s11 + $0x2bc] sm:$0xf0] }
  0xad   :  { %v1060_v10 = vsel %vm1058_vm2, %v2572_v9, 0 }
  0xae   :  { %1069 = vmatpush.bf16.msra.mxu2 %v1060_v10 }
  0xaf   :  { %v695_v12 = vpop.f32.mrf.mxu2 }
  0xb0   :  { %v708_v15 = vpop.f32.mrf.mxu3 }
  0xb7   :  { %v745_v17 = vpop.f32.mrf.mxu2 }
  0xbf   :  { %v747_v24 = vpop.f32.mrf.mxu2 }
  0xc0   :  { %v719_v21 = vpop.f32.mrf.mxu0  ;;  %v3158_v24 = vld [vmem:[%s4857_s9 + $0x4] sm:$0xf0] }
  0xc1   :  { %v720_v23 = vadd.f32 %v719_v21, %v707_v20  ;;  %v2586_v21 = vld [vmem:[%s4857_s9 + $0x18] sm:$0xf0] }
  0xc2   :  { %v2589_v22 = vor.u32 %v3159_v19, %v2586_v21  ;;  %v3238_v19 = vld [vmem:[%s4859_s11 + $0x26c] sm:$0xf] }
  0xc3   :  { %v732_v25 = vpop.f32.mrf.mxu1 }
  0xc4   :  { %v733_v26 = vadd.f32 %v732_v25, %v720_v23  ;;  %1129 = vmatpush.bf16.msra.mxu1 %v2589_v22  ;;  %v2576_v23 = vld [vmem:[%s4857_s9] sm:$0xf]  ;;  %v3157_v25 = vld [vmem:[%s4857_s9 + $0x4] sm:$0xf] }
  0xc6   :  { %v746_v28 = vadd.f32 %v745_v17, %v733_v26  ;;  %v2584_v17 = vld [vmem:[%s4857_s9 + $0x10] sm:$0xf]  ;;  %v2577_v26 = vor.u32 %v3158_v24, %v2576_v23 }
  0xc7   :  { %v2585_v20 = vor.u32 %v3160_v18, %v2584_v17  ;;  %v3182_v17 = vld [vmem:[%s4859_s11 + $0xac] sm:$0xf]  ;;  %v2680_v18 = vld [vmem:[%s4859_s11 + $0xc4] sm:$0xf0]  ;;  %v2650_v24 = vld [vmem:[%s4859_s11 + $0x70] sm:$0xf] }
  0xc8   :  { %v840_v29 = vmax.f32 %v746_v28, 0.0  ;;  %v721_v31 = vpop.f32.mrf.mxu0  ;;  %v758_v35 = vpop.f32.mrf.mxu3  ;;  %v2581_v28 = vor.u32 %v3157_v25, %v2578_v27  ;;  %v2683_v23 = vor.u32 %v3182_v17, %v2680_v18  ;;  %v3178_v25 = vld [vmem:[%s4859_s11 + $0x88] sm:$0xf0]  ;;  %v3263_v17 = vld [vmem:[%s4859_s11 + $0x330] sm:$0xf0] }
  0xc9   :  { %v759_v44 = vadd.f32 %v758_v35, %v161_v42  ;;  %1116 = vmatpush.bf16.msrb.mxu0 %v2585_v20  ;;  %v3213_v31 = vld [vmem:[%s4859_s11 + $0x1a0] sm:$0xf0]  ;;  %v3210_v35 = vld [vmem:[%s4859_s11 + $0x18c] sm:$0xf]  ;;  %v2762_v42 = vld [vmem:[%s4859_s11 + $0x150] sm:$0xf] }
  0xca   :  { %v842_v33 = vpack.c.bf16 %v840_v29, %v840_v29  ;;  %1130 = vmatpush.bf16.msra.mxu1 %v2581_v28  ;;  %v2790_v29 = vld [vmem:[%s4859_s11 + $0x188] sm:$0xf]  ;;  %v3234_v28 = vld [vmem:[%s4859_s11 + $0x248] sm:$0xf0]  ;;  %v3204_v18 = vld [vmem:[%s4859_s11 + $0x15c] sm:$0xf] }
  0xcb   :  { %v771_v34 = vpop.f32.mrf.mxu2  ;;  %v734_v36 = vpop.f32.mrf.mxu1  ;;  %v2904_v20 = vld [vmem:[%s4859_s11 + $0x284] sm:$0xf0] }
  0xcc   :  { %984 = vmatmul.bf16.vlgmr.msrb.gmra.mxu1 %v842_v33  ;;  %v772_v46 = vadd.f32 %v771_v34, %v759_v44  ;;  %v2791_v33 = vor.u32 %v3213_v31, %v2790_v29  ;;  %v3269_v34 = vld [vmem:[%s4859_s11 + $0x360] sm:$0xf0]  ;;  %v2792_v36 = vld [vmem:[%s4859_s11 + $0x1a4] sm:$0xf0]  ;;  %v2907_v27 = vor.u32 %v3238_v19, %v2904_v20  ;;  %v3175_v29 = vld [vmem:[%s4859_s11 + $0x74] sm:$0xf] }
  0xcd   :  { %1117 = vmatpush.bf16.msrb.mxu0 %v2577_v26  ;;  %v3015_v38 = vor.u32 %v3269_v34, %v3014_v32  ;;  %v2795_v39 = vor.u32 %v3210_v35, %v2792_v36  ;;  %v2874_v26 = vld [vmem:[%s4859_s11 + $0x230] sm:$0xf]  ;;  %v3231_v32 = vld [vmem:[%s4859_s11 + $0x234] sm:$0xf]  ;;  %v3276_v34 = vld [vmem:[%s4856_s8] ss:$0 sm:$0xff]  ;;  %v2651_v35 = vor.u32 %v3178_v25, %v2650_v24 }
  0xce   :  { %1860 = vmatpush.bf16.msrb.mxu2 %v2791_v33  ;;  %v2652_v31 = vld [vmem:[%s4859_s11 + $0x8c] sm:$0xf0]  ;;  %v2875_v36 = vor.u32 %v3234_v28, %v2874_v26  ;;  %v2772_v20 = vld [vmem:[%s4859_s11 + $0x174] sm:$0xf0]  ;;  %v2742_v25 = vld [vmem:[%s4859_s11 + $0x120] sm:$0xf] }
  0xcf   :  { %1873 = vmatpush.bf16.msra.mxu3 %v3015_v38  ;;  %v2876_v33 = vld [vmem:[%s4859_s11 + $0x24c] sm:$0xf0]  ;;  %v2655_v38 = vor.u32 %v3175_v29, %v2652_v31  ;;  %v3200_v26 = vld [vmem:[%s4859_s11 + $0x138] sm:$0xf0]  ;;  %v2966_v29 = vld [vmem:[%s4859_s11 + $0x2e0] sm:$0xf] }
  0xd0   :  { %v760_v41 = vpop.f32.mrf.mxu3  ;;  %v3256_v31 = vld [vmem:[%s4859_s11 + $0x2f8] sm:$0xf0] }
  0xd1   :  { %v3016_v41 = vld [vmem:[%s4859_s11 + $0x364] sm:$0xf0] }
  0xd3   :  { %v773_v40 = vpop.f32.mrf.mxu2 }
  0xd4   :  { %v3266_v40 = vld [vmem:[%s4859_s11 + $0x34c] sm:$0xf] }
  0xd5   :  { %v3019_v44 = vor.u32 %v3266_v40, %v3016_v41  ;;  %v3171_v40 = vld [vmem:[%s4859_s11 + $0x50] sm:$0xf0]  ;;  %v2846_v41 = vld [vmem:[%s4859_s11 + $0x1f8] sm:$0xf] }
  0xd7   :  { %1899 = vmatpush.bf16.msrb.mxu1 %v3019_v44  ;;  %v3227_v44 = vld [vmem:[%s4859_s11 + $0x210] sm:$0xf0] }
  0xe0   :  { %v784_v45 = vpop.f32.mrf.mxu0 }
  0xe1   :  { %v785_v48 = vadd.f32 %v784_v45, %v772_v46  ;;  %v3206_v45 = vld [vmem:[%s4859_s11 + $0x168] sm:$0xf0]  ;;  %v2986_v46 = vld [vmem:[%s4859_s11 + $0x310] sm:$0xf] }
  0xe3   :  { %v797_v47 = vpop.f32.mrf.mxu1 }
  0xe4   :  { %v798_v52 = vadd.f32 %v797_v47, %v785_v48  ;;  %v3262_v47 = vld [vmem:[%s4859_s11 + $0x328] sm:$0xf0]  ;;  %v2763_v48 = vor.u32 %v3206_v45, %v2762_v42  ;;  %v2879_v42 = vor.u32 %v3231_v32, %v2876_v33  ;;  %v3168_v45 = vld [vmem:[%s4859_s11 + $0x3c] sm:$0xf]  ;;  %v3197_v32 = vld [vmem:[%s4859_s11 + $0x124] sm:$0xf] }
  0xe5   :  { %v2744_v33 = vld [vmem:[%s4859_s11 + $0x13c] sm:$0xf0] }
  0xe6   :  { %1861 = vmatpush.bf16.msrb.mxu2 %v2763_v48  ;;  %v2848_v48 = vld [vmem:[%s4859_s11 + $0x214] sm:$0xf0] }
  0xe8   :  { %v810_v49 = vpop.f32.mrf.mxu3  ;;  %v786_v50 = vpop.f32.mrf.mxu0 }
  0xe9   :  { %v811_v54 = vadd.f32 %v810_v49, %v798_v52  ;;  %v2987_v49 = vor.u32 %v3262_v47, %v2986_v46  ;;  %v3203_v50 = vld [vmem:[%s4859_s11 + $0x154] sm:$0xf]  ;;  %v2764_v52 = vld [vmem:[%s4859_s11 + $0x16c] sm:$0xf0]  ;;  %v2624_v46 = vld [vmem:[%s4859_s11 + $0x54] sm:$0xf0] }
  0xea   :  { %v3224_v47 = vld [vmem:[%s4859_s11 + $0x1fc] sm:$0xf] }
  0xeb   :  { %v823_v53 = vpop.f32.mrf.mxu2  ;;  %v799_v55 = vpop.f32.mrf.mxu1  ;;  %1874 = vmatpush.bf16.msra.mxu3 %v2987_v49 }
  0xec   :  { %v824_v56 = vadd.f32 %v823_v53, %v811_v54  ;;  %v3259_v53 = vld [vmem:[%s4859_s11 + $0x314] sm:$0xf]  ;;  %v2767_v54 = vor.u32 %v3203_v50, %v2764_v52  ;;  %v2988_v55 = vld [vmem:[%s4859_s11 + $0x32c] sm:$0xf0]  ;;  %v2594_v50 = vld [vmem:[%s4859_s11] sm:$0xf] }
  0xed   :  { %v3164_v52 = vld [vmem:[%s4859_s11 + $0x18] sm:$0xf0] }
  0xf0   :  { %v812_v57 = vpop.f32.mrf.mxu3  ;;  %v836_v59 = vpop.f32.mrf.mxu0 }
  0xf1   :  { %v837_v60 = vadd.f32 %v836_v59, %v824_v56  ;;  %v2734_v56 = vld [vmem:[%s4859_s11 + $0x118] sm:$0xf]  ;;  %v3199_v57 = vld [vmem:[%s4859_s11 + $0x130] sm:$0xf0]  ;;  %v2991_v59 = vor.u32 %v3259_v53, %v2988_v55  ;;  %v2627_v55 = vor.u32 %v3168_v45, %v2624_v46  ;;  %v3249_v45 = vld [vmem:[%s4859_s11 + $0x2c0] sm:$0xf0] }
  0xf2   :  { %v3190_v46 = vld [vmem:[%s4859_s11 + $0xec] sm:$0xf] }
  0xf3   :  { %v825_v61 = vpop.f32.mrf.mxu2  ;;  %v841_v62 = vmax.f32 %v837_v60, 0.0  ;;  %v2958_v60 = vld [vmem:[%s4859_s11 + $0x2d8] sm:$0xf]  ;;  %1900 = vmatpush.bf16.msrb.mxu1 %v2991_v59  ;;  %v3161_v59 = vld [vmem:[%s4859_s11 + $0x4] sm:$0xf] }
  0xf4   :  { %v3255_v61 = vld [vmem:[%s4859_s11 + $0x2f0] sm:$0xf0] }
  0xf5   :  { %v843_v63 = vpack.c.bf16 %v841_v62, %v841_v62  ;;  %v3196_v62 = vld [vmem:[%s4859_s11 + $0x11c] sm:$0xf]  ;;  %v2959_v3 = vor.u32 %v3255_v61, %v2958_v60  ;;  %v2851_v61 = vor.u32 %v3224_v47, %v2848_v48  ;;  %v2716_v47 = vld [vmem:[%s4859_s11 + $0x104] sm:$0xf0]  ;;  %v3246_v48 = vld [vmem:[%s4859_s11 + $0x2ac] sm:$0xf] }
  0xf7   :  { %997 = vmatmul.bf16.vlgmr.msrb.gmra.mxu3 %v843_v63  ;;  %v2735_v63 = vor.u32 %v3199_v57, %v2734_v56  ;;  %v2818_v56 = vld [vmem:[%s4859_s11 + $0x1c0] sm:$0xf]  ;;  %v3220_v57 = vld [vmem:[%s4859_s11 + $0x1d8] sm:$0xf0] }
  0xf8   :  { %v838_v0 = vpop.f32.mrf.mxu0  ;;  %1875 = vmatpush.bf16.msra.mxu3 %v2959_v3  ;;  %v3022_v3 = vld [vmem:[%s4859_s11 + $0x350] sm:$0xf] }
  0xf9   :  { %v2736_v0 = vld [vmem:[%s4859_s11 + $0x134] sm:$0xf0]  ;;  %1862 = vmatpush.bf16.msrb.mxu2 %v2735_v63  ;;  %v3217_v63 = vld [vmem:[%s4859_s11 + $0x1c4] sm:$0xf] }
  0xfa   :  { %v2739_v43 = vor.u32 %v3196_v62, %v2736_v0  ;;  %v2596_v62 = vld [vmem:[%s4859_s11 + $0x1c] sm:$0xf0] }
  0xfb   :  { %v2820_v0 = vld [vmem:[%s4859_s11 + $0x1dc] sm:$0xf0] }
 0x149   :  { %v985_v1 = vpop.f32.mrf.mxu1 }
 0x14a   :  { %v986_v37 = vadd.f32 %v3274_v30, %v985_v1  ;;  %v3252_v1 = vld [vmem:[%s4859_s11 + $0x2dc] sm:$0xf]  ;;  %v2706_v30 = vld [vmem:[%s4859_s11 + $0xe0] sm:$0xf] }
 0x151   :  { %v987_v51 = vpop.f32.mrf.mxu1 }
 0x152   :  { %v2960_v51 = vld [vmem:[%s4859_s11 + $0x2f4] sm:$0xf0] }
 0x17a   :  { %v998_v2 = vpop.f32.mrf.mxu3 }
 0x17b   :  { %v999_v4 = vadd.f32 %v998_v2, %v986_v37  ;;  %v3192_v37 = vld [vmem:[%s4859_s11 + $0xf8] sm:$0xf0]  ;;  %v2930_v2 = vld [vmem:[%s4859_s11 + $0x2a0] sm:$0xf] }
 0x17c   :  { %v2707_v9 = vor.u32 %v3192_v37, %v2706_v30  ;;  %v3270_v30 = vld [vmem:[%s4859_s11 + $0x368] sm:$0xf0]  ;;  %v3211_v37 = vld [vmem:[%s4859_s11 + $0x194] sm:$0xf] }
 0x17d   :  { %v1002_v58 = vmax.f32 %v999_v4, 0.0  ;;  %v2963_v4 = vor.u32 %v3252_v1, %v2960_v51  ;;  %v2798_v1 = vld [vmem:[%s4859_s11 + $0x190] sm:$0xf]  ;;  %v3214_v51 = vld [vmem:[%s4859_s11 + $0x1a8] sm:$0xf0] }
 0x17e   :  { %1863 = vmatpush.bf16.msrb.mxu2 %v2707_v9  ;;  %v2823_v9 = vor.u32 %v3217_v63, %v2820_v0  ;;  %v2912_v63 = vld [vmem:[%s4859_s11 + $0x28c] sm:$0xf0] }
 0x17f   :  { %v1003_v5 = vpack.c.bf16 %v1002_v58, %v1002_v58  ;;  %v3248_v58 = vld [vmem:[%s4859_s11 + $0x2b8] sm:$0xf0]  ;;  %1901 = vmatpush.bf16.msrb.mxu1 %v2963_v4  ;;  %v2819_v4 = vor.u32 %v3220_v57, %v2818_v56  ;;  %v2910_v57 = vld [vmem:[%s4859_s11 + $0x270] sm:$0xf] }
 0x180   :  { %v2931_v10 = vor.u32 %v3248_v58, %v2930_v2  ;;  %v2595_v2 = vor.u32 %v3164_v52, %v2594_v50  ;;  %v2800_v58 = vld [vmem:[%s4859_s11 + $0x1ac] sm:$0xf0] }
 0x181   :  { %2568 = vmatmul.msk.bf16.vlgmr.msra.gmra.mxu0 %vm1024_vm1, %v1003_v5  ;;  %v3189_v5 = vld [vmem:[%s4859_s11 + $0xe4] sm:$0xf] }
 0x182   :  { %v1000_v6 = vpop.f32.mrf.mxu3  ;;  %1886 = vmatpush.bf16.msra.mxu0 %v2795_v39  ;;  %1876 = vmatpush.bf16.msra.mxu3 %v2931_v10  ;;  %v2622_v39 = vld [vmem:[%s4859_s11 + $0x38] sm:$0xf]  ;;  %v2799_v10 = vor.u32 %v3214_v51, %v2798_v1 }
 0x183   :  { %v2708_v6 = vld [vmem:[%s4859_s11 + $0xfc] sm:$0xf0]  ;;  %v2623_v49 = vor.u32 %v3171_v40, %v2622_v39  ;;  %v2714_v39 = vld [vmem:[%s4859_s11 + $0xe8] sm:$0xf]  ;;  %v3193_v40 = vld [vmem:[%s4859_s11 + $0x100] sm:$0xf0] }
 0x184   :  { %v2715_v50 = vor.u32 %v3193_v40, %v2714_v39  ;;  %v2658_v51 = vld [vmem:[%s4859_s11 + $0x78] sm:$0xf] }
 0x186   :  { %1887 = vmatpush.bf16.msra.mxu0 %v2767_v54  ;;  %v2847_v54 = vor.u32 %v3227_v44, %v2846_v41  ;;  %v2747_v41 = vor.u32 %v3197_v32, %v2744_v33  ;;  %v2938_v44 = vld [vmem:[%s4859_s11 + $0x2a8] sm:$0xf]  ;;  %v3218_v33 = vld [vmem:[%s4859_s11 + $0x1cc] sm:$0xf] }
 0x187   :  { %v2939_v52 = vor.u32 %v3249_v45, %v2938_v44  ;;  %v2806_v45 = vld [vmem:[%s4859_s11 + $0x198] sm:$0xf] }
 0x18a   :  { %1888 = vmatpush.bf16.msra.mxu0 %v2739_v43 }
 0x1fe   :  { %v1037_v12 = vpop.f32.mrf.mxu0 }
 0x1ff   :  { %v1038_v13 = vadd.f32 %v3275_v11, %v1037_v12  ;;  %v2711_v11 = vor.u32 %v3189_v5, %v2708_v6  ;;  %v2678_v12 = vld [vmem:[%s4859_s11 + $0xa8] sm:$0xf]  ;;  %v3267_v5 = vld [vmem:[%s4859_s11 + $0x354] sm:$0xf]  ;;  %v3024_v6 = vld [vmem:[%s4859_s11 + $0x36c] sm:$0xf0] }
 0x201   :  { %v1041_v14 = vmax.f32 %v1038_v13, 0.0  ;;  %v3185_v13 = vld [vmem:[%s4859_s11 + $0xc0] sm:$0xf0]  ;;  %1889 = vmatpush.bf16.msra.mxu0 %v2711_v11  ;;  %v3023_v11 = vor.u32 %v3270_v30, %v3022_v3  ;;  %v3179_v3 = vld [vmem:[%s4859_s11 + $0x90] sm:$0xf0] }
 0x202   :  { %v2679_v21 = vor.u32 %v3185_v13, %v2678_v12  ;;  %v2770_v12 = vld [vmem:[%s4859_s11 + $0x158] sm:$0xf]  ;;  %v3207_v13 = vld [vmem:[%s4859_s11 + $0x170] sm:$0xf0] }
 0x203   :  { %v1042_v15 = vpack.c.bf16 %v1041_v14, %v1041_v14  ;;  %v2902_v14 = vld [vmem:[%s4859_s11 + $0x268] sm:$0xf] }
 0x204   :  { %1864 = vmatpush.bf16.msrb.mxu2 %v2679_v21  ;;  %v3260_v21 = vld [vmem:[%s4859_s11 + $0x31c] sm:$0xf] }
 0x205   :  { %2573 = vmatmul.msk.bf16.vlgmr.msra.gmra.mxu2 %vm1054_vm3, %v1042_v15  ;;  %v2935_v15 = vor.u32 %v3245_v7, %v2932_v8  ;;  %1890 = vmatpush.bf16.msra.mxu0 %v2683_v23  ;;  %v2599_v8 = vor.u32 %v3161_v59, %v2596_v62  ;;  %v2771_v23 = vor.u32 %v3207_v13, %v2770_v12  ;;  %v3242_v59 = vld [vmem:[%s4859_s11 + $0x288] sm:$0xf0]  ;;  %v3239_v62 = vld [vmem:[%s4859_s11 + $0x274] sm:$0xf]  ;;  %v3172_v12 = vld [vmem:[%s4859_s11 + $0x58] sm:$0xf0] }
 0x206   :  { %v1039_v16 = vpop.f32.mrf.mxu0  ;;  %v2911_v1 = vor.u32 %v3242_v59, %v2910_v57  ;;  %v2915_v30 = vor.u32 %v3239_v62, %v2912_v63  ;;  %v3208_v62 = vld [vmem:[%s4859_s11 + $0x178] sm:$0xf0] }
 0x207   :  { %v3241_v16 = vld [vmem:[%s4859_s11 + $0x280] sm:$0xf0]  ;;  %1902 = vmatpush.bf16.msrb.mxu1 %v2935_v15  ;;  %v3027_v15 = vor.u32 %v3267_v5, %v3024_v6  ;;  %v3232_v5 = vld [vmem:[%s4859_s11 + $0x23c] sm:$0xf]  ;;  %v2884_v6 = vld [vmem:[%s4859_s11 + $0x254] sm:$0xf0] }
 0x208   :  { %v2903_v22 = vor.u32 %v3241_v16, %v2902_v14  ;;  %1865 = vmatpush.bf16.msrb.mxu2 %v2651_v35  ;;  %v2803_v14 = vor.u32 %v3211_v37, %v2800_v58  ;;  %v2994_v16 = vld [vmem:[%s4859_s11 + $0x318] sm:$0xf]  ;;  %v2968_v35 = vld [vmem:[%s4859_s11 + $0x2fc] sm:$0xf0] }
 0x209   :  { %1891 = vmatpush.bf16.msra.mxu0 %v2655_v38  ;;  %v2995_v24 = vor.u32 %v3263_v17, %v2994_v16  ;;  %v2967_v38 = vor.u32 %v3256_v31, %v2966_v29  ;;  %v2882_v37 = vld [vmem:[%s4859_s11 + $0x238] sm:$0xf]  ;;  %v3169_v16 = vld [vmem:[%s4859_s11 + $0x44] sm:$0xf]  ;;  %v2604_v29 = vld [vmem:[%s4859_s11 + $0x24] sm:$0xf0] }
 0x20a   :  { %1877 = vmatpush.bf16.msra.mxu3 %v2903_v22  ;;  %v2996_v22 = vld [vmem:[%s4859_s11 + $0x334] sm:$0xf0] }
 0x20b   :  { %1903 = vmatpush.bf16.msrb.mxu1 %v2907_v27  ;;  %v2775_v27 = vor.u32 %v3204_v18, %v2772_v20  ;;  %v2999_v28 = vor.u32 %v3260_v21, %v2996_v22  ;;  %v2660_v58 = vld [vmem:[%s4859_s11 + $0x94] sm:$0xf0]  ;;  %v2632_v18 = vld [vmem:[%s4859_s11 + $0x5c] sm:$0xf0] }
 0x20c   :  { %1866 = vmatpush.bf16.msrb.mxu2 %v2623_v49  ;;  %v2940_v49 = vld [vmem:[%s4859_s11 + $0x2c4] sm:$0xf0]  ;;  %v2856_v20 = vld [vmem:[%s4859_s11 + $0x21c] sm:$0xf0]  ;;  %v2635_v21 = vor.u32 %v3169_v16, %v2632_v18  ;;  %v2722_v18 = vld [vmem:[%s4859_s11 + $0xf0] sm:$0xf] }
 0x20d   :  { %1892 = vmatpush.bf16.msra.mxu0 %v2627_v55  ;;  %v2719_v55 = vor.u32 %v3190_v46, %v2716_v47  ;;  %v2943_v56 = vor.u32 %v3246_v48, %v2940_v49  ;;  %v3215_v46 = vld [vmem:[%s4859_s11 + $0x1b0] sm:$0xf0]  ;;  %v3030_v47 = vld [vmem:[%s4859_s11 + $0x358] sm:$0xf]  ;;  %v3212_v49 = vld [vmem:[%s4859_s11 + $0x19c] sm:$0xf] }
 0x20e   :  { %1878 = vmatpush.bf16.msra.mxu3 %v2875_v36  ;;  %v2743_v36 = vor.u32 %v3200_v26, %v2742_v25  ;;  %v2826_v25 = vld [vmem:[%s4859_s11 + $0x1c8] sm:$0xf]  ;;  %v3271_v48 = vld [vmem:[%s4859_s11 + $0x370] sm:$0xf0]  ;;  %v2807_v59 = vor.u32 %v3215_v46, %v2806_v45  ;;  %v2666_v45 = vld [vmem:[%s4859_s11 + $0x80] sm:$0xf] }
 0x20f   :  { %1904 = vmatpush.bf16.msrb.mxu1 %v2879_v42  ;;  %v3180_v46 = vld [vmem:[%s4859_s11 + $0x98] sm:$0xf0] }
 0x210   :  { %1867 = vmatpush.bf16.msrb.mxu2 %v2595_v2  ;;  %v3235_v2 = vld [vmem:[%s4859_s11 + $0x250] sm:$0xf0] }
 0x211   :  { %1893 = vmatpush.bf16.msra.mxu0 %v2599_v8  ;;  %v2883_v8 = vor.u32 %v3235_v2, %v2882_v37  ;;  %v3004_v37 = vld [vmem:[%s4859_s11 + $0x33c] sm:$0xf0] }
 0x212   :  { %1879 = vmatpush.bf16.msra.mxu3 %v2847_v54  ;;  %v3186_v54 = vld [vmem:[%s4859_s11 + $0xc8] sm:$0xf0] }
 0x213   :  { %1905 = vmatpush.bf16.msrb.mxu1 %v2851_v61  ;;  %v2688_v61 = vld [vmem:[%s4859_s11 + $0xcc] sm:$0xf0] }
 0x214   :  { %1912 = vmatpush.bf16.msra.mxu2 %v2799_v10  ;;  %v2887_v10 = vor.u32 %v3232_v5, %v2884_v6  ;;  %v2750_v6 = vld [vmem:[%s4859_s11 + $0x128] sm:$0xf] }
 0x216   :  { %1880 = vmatpush.bf16.msra.mxu3 %v2819_v4  ;;  %v3176_v4 = vld [vmem:[%s4859_s11 + $0x7c] sm:$0xf] }
 0x217   :  { %1906 = vmatpush.bf16.msrb.mxu1 %v2823_v9  ;;  %v2663_v9 = vor.u32 %v3176_v4, %v2660_v58 }
 0x218   :  { %1913 = vmatpush.bf16.msra.mxu2 %v2771_v23  ;;  %v2602_v23 = vld [vmem:[%s4859_s11 + $0x8] sm:$0xf] }
 0x21a   :  { %1925 = vmatpush.bf16.msrb.mxu3 %v3023_v11  ;;  %v2630_v11 = vld [vmem:[%s4859_s11 + $0x40] sm:$0xf] }
 0x21b   :  { %v2631_v13 = vor.u32 %v3172_v12, %v2630_v11  ;;  %v3257_v11 = vld [vmem:[%s4859_s11 + $0x300] sm:$0xf0]  ;;  %v3198_v12 = vld [vmem:[%s4859_s11 + $0x12c] sm:$0xf] }
 0x21c   :  { %1914 = vmatpush.bf16.msra.mxu2 %v2743_v36  ;;  %v1081_v36 = vld [vmem:[%s4858_s10] sm:$0x3] }
 0x21d   :  { %v1084_v39 = vperm.slane %v1081_v36, 1 }
 0x21e   :  { %1926 = vmatpush.bf16.msrb.mxu3 %v2995_v24  ;;  %v3165_v24 = vld [vmem:[%s4859_s11 + $0x20] sm:$0xf0] }
 0x21f   :  { %v2603_v26 = vor.u32 %v3165_v24, %v2602_v23  ;;  %v3250_v23 = vld [vmem:[%s4859_s11 + $0x2c8] sm:$0xf0]  ;;  %v3191_v24 = vld [vmem:[%s4859_s11 + $0xf4] sm:$0xf] }
 0x220   :  { %1915 = vmatpush.bf16.msra.mxu2 %v2715_v50  ;;  %v2808_v50 = vld [vmem:[%s4859_s11 + $0x1b4] sm:$0xf0] }
 0x221   :  { %v2811_v63 = vor.u32 %v3212_v49, %v2808_v50  ;;  %v2890_v49 = vld [vmem:[%s4859_s11 + $0x240] sm:$0xf]  ;;  %v3236_v50 = vld [vmem:[%s4859_s11 + $0x258] sm:$0xf0] }
 0x222   :  { %1927 = vmatpush.bf16.msrb.mxu3 %v2967_v38  ;;  %v1083_v38 = vperm.slane %v1081_v36, 0  ;;  %v3243_v36 = vld [vmem:[%s4859_s11 + $0x290] sm:$0xf0] }
 0x226   :  { %1928 = vmatpush.bf16.msrb.mxu3 %v2939_v52 }
 0x22a   :  { %1929 = vmatpush.bf16.msrb.mxu3 %v2911_v1  ;;  %v3002_v1 = vld [vmem:[%s4859_s11 + $0x320] sm:$0xf] }
 0x22e   :  { %1930 = vmatpush.bf16.msrb.mxu3 %v2883_v8 }
 0x288   :  { %v1071_v53 = vpop.f32.mrf.mxu2 }
 0x289   :  { %v1072_v60 = vadd.f32 %v3276_v34, %v1071_v53  ;;  %v3253_v34 = vld [vmem:[%s4859_s11 + $0x2e4] sm:$0xf]  ;;  %v2686_v53 = vld [vmem:[%s4859_s11 + $0xb0] sm:$0xf] }
 0x28a   :  { %v2971_v42 = vor.u32 %v3253_v34, %v2968_v35  ;;  %v2687_v0 = vor.u32 %v3186_v54, %v2686_v53  ;;  %v2828_v34 = vld [vmem:[%s4859_s11 + $0x1e4] sm:$0xf0]  ;;  %v3268_v54 = vld [vmem:[%s4859_s11 + $0x35c] sm:$0xf] }
 0x28b   :  { %v1075_v43 = vmax.f32 %v1072_v60, 0.0  ;;  %v3183_v60 = vld [vmem:[%s4859_s11 + $0xb4] sm:$0xf]  ;;  %v2831_v35 = vor.u32 %v3218_v33, %v2828_v34 }
 0x28c   :  { %1916 = vmatpush.bf16.msra.mxu2 %v2687_v0 }
 0x28d   :  { %v1076_v7 = vpack.c.bf16 %v1075_v43, %v1075_v43  ;;  %v2691_v43 = vor.u32 %v3183_v60, %v2688_v61  ;;  %v3031_v60 = vor.u32 %v3271_v48, %v3030_v47  ;;  %v2778_v61 = vld [vmem:[%s4859_s11 + $0x160] sm:$0xf] }
 0x28e   :  { %v2779_v58 = vor.u32 %v3208_v62, %v2778_v61  ;;  %v2638_v61 = vld [vmem:[%s4859_s11 + $0x48] sm:$0xf]  ;;  %v3173_v62 = vld [vmem:[%s4859_s11 + $0x60] sm:$0xf0] }
 0x28f   :  { %2590 = vmatmul.msk.bf16.vlgmr.msrb.gmra.mxu0 %vm1024_vm1, %v1076_v7  ;;  %2591 = vmatmul.msk.bf16.vlgmr.msra.gmra.mxu1 %vm1024_vm1, %v1076_v7  ;;  %v2659_v7 = vor.u32 %v3179_v3, %v2658_v51  ;;  %v3264_v51 = vld [vmem:[%s4859_s11 + $0x338] sm:$0xf0]  ;;  %v3205_v3 = vld [vmem:[%s4859_s11 + $0x164] sm:$0xf] }
 0x290   :  { %v1073_v19 = vpop.f32.mrf.mxu2  ;;  %1938 = vmatpush.bf16.msrb.mxu0 %v2803_v14  ;;  %1951 = vmatpush.bf16.msra.mxu1 %v3027_v15  ;;  %v2854_v14 = vld [vmem:[%s4859_s11 + $0x200] sm:$0xf]  ;;  %v3228_v15 = vld [vmem:[%s4859_s11 + $0x218] sm:$0xf0]  ;;  %v3003_v5 = vor.u32 %v3264_v51, %v3002_v1  ;;  %v2862_v1 = vld [vmem:[%s4859_s11 + $0x208] sm:$0xf] }
 0x291   :  { %1917 = vmatpush.bf16.msra.mxu2 %v2659_v7  ;;  %v2855_v17 = vor.u32 %v3228_v15, %v2854_v14  ;;  %v3225_v19 = vld [vmem:[%s4859_s11 + $0x204] sm:$0xf]  ;;  %v3254_v14 = vld [vmem:[%s4859_s11 + $0x2ec] sm:$0xf]  ;;  %v2976_v15 = vld [vmem:[%s4859_s11 + $0x304] sm:$0xf0] }
 0x292   :  { %v2859_v22 = vor.u32 %v3225_v19, %v2856_v20  ;;  %v3201_v7 = vld [vmem:[%s4859_s11 + $0x140] sm:$0xf0]  ;;  %v3194_v19 = vld [vmem:[%s4859_s11 + $0x108] sm:$0xf0] }
 0x293   :  { %1931 = vmatpush.bf16.msrb.mxu3 %v2855_v17  ;;  %v2751_v16 = vor.u32 %v3201_v7, %v2750_v6  ;;  %v3229_v51 = vld [vmem:[%s4859_s11 + $0x220] sm:$0xf0]  ;;  %v2834_v6 = vld [vmem:[%s4859_s11 + $0x1d0] sm:$0xf] }
 0x294   :  { %1939 = vmatpush.bf16.msrb.mxu0 %v2775_v27  ;;  %1952 = vmatpush.bf16.msra.mxu1 %v2999_v28  ;;  %v3221_v27 = vld [vmem:[%s4859_s11 + $0x1e0] sm:$0xf0]  ;;  %v3162_v28 = vld [vmem:[%s4859_s11 + $0xc] sm:$0xf] }
 0x295   :  { %1918 = vmatpush.bf16.msra.mxu2 %v2631_v13  ;;  %v2827_v31 = vor.u32 %v3221_v27, %v2826_v25  ;;  %v2607_v32 = vor.u32 %v3162_v28, %v2604_v29  ;;  %v2752_v13 = vld [vmem:[%s4859_s11 + $0x144] sm:$0xf0]  ;;  %v2724_v25 = vld [vmem:[%s4859_s11 + $0x10c] sm:$0xf0]  ;;  %v2723_v28 = vor.u32 %v3194_v19, %v2722_v18 }
 0x296   :  { %v2755_v20 = vor.u32 %v3198_v12, %v2752_v13  ;;  %v2948_v27 = vld [vmem:[%s4859_s11 + $0x2cc] sm:$0xf0]  ;;  %v2727_v33 = vor.u32 %v3191_v24, %v2724_v25  ;;  %v3219_v12 = vld [vmem:[%s4859_s11 + $0x1d4] sm:$0xf]  ;;  %v2786_v24 = vld [vmem:[%s4859_s11 + $0x168] sm:$0xf] }
 0x297   :  { %1932 = vmatpush.bf16.msrb.mxu3 %v2827_v31  ;;  %v2694_v31 = vld [vmem:[%s4859_s11 + $0xb8] sm:$0xf]  ;;  %v2836_v13 = vld [vmem:[%s4859_s11 + $0x1ec] sm:$0xf0]  ;;  %v3209_v25 = vld [vmem:[%s4859_s11 + $0x180] sm:$0xf0] }
 0x298   :  { %1940 = vmatpush.bf16.msrb.mxu0 %v2747_v41  ;;  %1953 = vmatpush.bf16.msra.mxu1 %v2971_v42 }
 0x299   :  { %1919 = vmatpush.bf16.msra.mxu2 %v2603_v26  ;;  %v3247_v26 = vld [vmem:[%s4859_s11 + $0x2b4] sm:$0xf] }
 0x29a   :  { %v2951_v34 = vor.u32 %v3247_v26, %v2948_v27  ;;  %v3010_v26 = vld [vmem:[%s4859_s11 + $0x328] sm:$0xf]  ;;  %v3265_v27 = vld [vmem:[%s4859_s11 + $0x340] sm:$0xf0] }
 0x29c   :  { %1941 = vmatpush.bf16.msrb.mxu0 %v2719_v55  ;;  %1954 = vmatpush.bf16.msra.mxu1 %v2943_v56  ;;  %v3032_v55 = vld [vmem:[%s4859_s11 + $0x374] sm:$0xf0] }
 0x29d   :  { %v3035_v0 = vor.u32 %v3268_v54, %v3032_v55  ;;  %v3233_v54 = vld [vmem:[%s4859_s11 + $0x244] sm:$0xf]  ;;  %v2892_v55 = vld [vmem:[%s4859_s11 + $0x25c] sm:$0xf0] }
 0x2a0   :  { %1942 = vmatpush.bf16.msrb.mxu0 %v2691_v43  ;;  %1955 = vmatpush.bf16.msra.mxu1 %v2915_v30  ;;  %v2780_v43 = vld [vmem:[%s4859_s11 + $0x17c] sm:$0xf0]  ;;  %v3261_v30 = vld [vmem:[%s4859_s11 + $0x324] sm:$0xf] }
 0x2a1   :  { %v2783_v8 = vor.u32 %v3205_v3, %v2780_v43  ;;  %v3170_v3 = vld [vmem:[%s4859_s11 + $0x4c] sm:$0xf]  ;;  %v2640_v43 = vld [vmem:[%s4859_s11 + $0x64] sm:$0xf0] }
 0x2a2   :  { %v2643_v7 = vor.u32 %v3170_v3, %v2640_v43  ;;  %v2618_v3 = vld [vmem:[%s4859_s11 + $0x18] sm:$0xf]  ;;  %v3167_v43 = vld [vmem:[%s4859_s11 + $0x30] sm:$0xf0] }
 0x2a4   :  { %1943 = vmatpush.bf16.msrb.mxu0 %v2663_v9  ;;  %1956 = vmatpush.bf16.msra.mxu1 %v2887_v10  ;;  %v3007_v9 = vor.u32 %v3261_v30, %v3004_v37  ;;  %v2974_v10 = vld [vmem:[%s4859_s11 + $0x2e8] sm:$0xf]  ;;  %v3226_v30 = vld [vmem:[%s4859_s11 + $0x20c] sm:$0xf] }
 0x2a5   :  { %v2975_v17 = vor.u32 %v3257_v11, %v2974_v10  ;;  %v2864_v37 = vld [vmem:[%s4859_s11 + $0x224] sm:$0xf0]  ;;  %v3163_v10 = vld [vmem:[%s4859_s11 + $0x14] sm:$0xf]  ;;  %v2612_v11 = vld [vmem:[%s4859_s11 + $0x2c] sm:$0xf0] }
 0x2a8   :  { %1944 = vmatpush.bf16.msrb.mxu0 %v2635_v21  ;;  %1957 = vmatpush.bf16.msra.mxu1 %v2859_v22  ;;  %v2979_v21 = vor.u32 %v3254_v14, %v2976_v15  ;;  %v2946_v22 = vld [vmem:[%s4859_s11 + $0x2b0] sm:$0xf]  ;;  %v2814_v14 = vld [vmem:[%s4859_s11 + $0x1a0] sm:$0xf]  ;;  %v3216_v15 = vld [vmem:[%s4859_s11 + $0x1b8] sm:$0xf0] }
 0x2a9   :  { %v2947_v29 = vor.u32 %v3250_v23, %v2946_v22  ;;  %v2815_v22 = vor.u32 %v3216_v15, %v2814_v14 }
 0x2ac   :  { %1945 = vmatpush.bf16.msrb.mxu0 %v2607_v32  ;;  %1958 = vmatpush.bf16.msra.mxu1 %v2831_v35  ;;  %v3187_v32 = vld [vmem:[%s4859_s11 + $0xd0] sm:$0xf0]  ;;  %v2918_v35 = vld [vmem:[%s4859_s11 + $0x278] sm:$0xf] }
 0x30c   :  { %v1119_v40 = vpop.f32.mrf.mxu0  ;;  %v1132_v41 = vpop.f32.mrf.mxu1 }
 0x30d   :  { %v1120_v42 = vadd.f32 %v1119_v40, %v1083_v38  ;;  %v1133_v44 = vadd.f32 %v1132_v41, %v1084_v39  ;;  %v3184_v38 = vld [vmem:[%s4859_s11 + $0xbc] sm:$0xf]  ;;  %v2696_v39 = vld [vmem:[%s4859_s11 + $0xd4] sm:$0xf0] }
 0x30e   :  { %v3240_v40 = vld [vmem:[%s4859_s11 + $0x27c] sm:$0xf]  ;;  %v2920_v41 = vld [vmem:[%s4859_s11 + $0x294] sm:$0xf0]  ;;  %v2699_v47 = vor.u32 %v3184_v38, %v2696_v39  ;;  %v3195_v39 = vld [vmem:[%s4859_s11 + $0x110] sm:$0xf0] }
 0x30f   :  { %v1136_v52 = vmax.f32 %v1120_v42, 0.0  ;;  %v1137_v53 = vmax.f32 %v1133_v44, 0.0  ;;  %v2695_v42 = vor.u32 %v3187_v32, %v2694_v31  ;;  %v2919_v44 = vor.u32 %v3243_v36, %v2918_v35  ;;  %v2758_v31 = vld [vmem:[%s4859_s11 + $0x130] sm:$0xf]  ;;  %v3202_v32 = vld [vmem:[%s4859_s11 + $0x148] sm:$0xf0] }
 0x310   :  { %v2923_v48 = vor.u32 %v3240_v40, %v2920_v41  ;;  %v2759_v35 = vor.u32 %v3202_v32, %v2758_v31  ;;  %v2730_v38 = vld [vmem:[%s4859_s11 + $0xf8] sm:$0xf]  ;;  %v3251_v41 = vld [vmem:[%s4859_s11 + $0x2d0] sm:$0xf0] }
 0x311   :  { %v4551_v56 = vpack.c.bf16 %v1136_v52, %v1136_v52  ;;  %v4553_v57 = vpack.c.bf16 %v1137_v53, %v1137_v53  ;;  %v3177_v52 = vld [vmem:[%s4859_s11 + $0x84] sm:$0xf]  ;;  %v2668_v53 = vld [vmem:[%s4859_s11 + $0x9c] sm:$0xf0]  ;;  %v2954_v40 = vld [vmem:[%s4859_s11 + $0x2b8] sm:$0xf] }
 0x313   :  { %1868 = vmatmul.bf16.vlgmr.msrb.gmra.mxu2 %v4551_v56  ;;  %1881 = vmatmul.bf16.vlgmr.msra.gmra.mxu3 %v4553_v57 }
 0x314   :  { %1894 = vmatmul.bf16.vlgmr.msra.gmra.mxu0 %v4551_v56  ;;  %1907 = vmatmul.bf16.vlgmr.msrb.gmra.mxu1 %v4553_v57  ;;  %v1121_v2 = vpop.f32.mrf.mxu0  ;;  %v1134_v4 = vpop.f32.mrf.mxu1 }
 0x315   :  { %1964 = vmatpush.bf16.msrb.mxu2 %v2807_v59  ;;  %1977 = vmatpush.bf16.msra.mxu3 %v3031_v60  ;;  %v2667_v59 = vor.u32 %v3180_v46, %v2666_v45  ;;  %v2891_v60 = vor.u32 %v3236_v50, %v2890_v49  ;;  %v2639_v2 = vor.u32 %v3173_v62, %v2638_v61  ;;  %v2702_v45 = vld [vmem:[%s4859_s11 + $0xc0] sm:$0xf]  ;;  %v3188_v46 = vld [vmem:[%s4859_s11 + $0xd8] sm:$0xf0]  ;;  %v2646_v61 = vld [vmem:[%s4859_s11 + $0x50] sm:$0xf] }
 0x316   :  { %1990 = vmatpush.bf16.msra.mxu0 %v2811_v63  ;;  %2003 = vmatpush.bf16.msrb.mxu1 %v3035_v0  ;;  %v2671_v63 = vor.u32 %v3177_v52, %v2668_v53  ;;  %v2895_v0 = vor.u32 %v3233_v54, %v2892_v55  ;;  %v2863_v4 = vor.u32 %v3229_v51, %v2862_v1  ;;  %v2674_v52 = vld [vmem:[%s4859_s11 + $0x88] sm:$0xf]  ;;  %v3181_v53 = vld [vmem:[%s4859_s11 + $0xa0] sm:$0xf0]  ;;  %v3174_v62 = vld [vmem:[%s4859_s11 + $0x68] sm:$0xf0] }
 0x317   :  { %v2703_v49 = vor.u32 %v3188_v46, %v2702_v45  ;;  %v2898_v54 = vld [vmem:[%s4859_s11 + $0x248] sm:$0xf]  ;;  %v3237_v55 = vld [vmem:[%s4859_s11 + $0x260] sm:$0xf0]  ;;  %v2647_v1 = vor.u32 %v3174_v62, %v2646_v61 }
 0x319   :  { %1965 = vmatpush.bf16.msrb.mxu2 %v2779_v58  ;;  %1978 = vmatpush.bf16.msra.mxu3 %v3003_v5  ;;  %v2610_v58 = vld [vmem:[%s4859_s11 + $0x10] sm:$0xf]  ;;  %v3166_v5 = vld [vmem:[%s4859_s11 + $0x28] sm:$0xf0] }
 0x31a   :  { %1991 = vmatpush.bf16.msra.mxu0 %v2783_v8  ;;  %2004 = vmatpush.bf16.msrb.mxu1 %v3007_v9  ;;  %v2867_v8 = vor.u32 %v3226_v30, %v2864_v37  ;;  %v3222_v9 = vld [vmem:[%s4859_s11 + $0x1e8] sm:$0xf0]  ;;  %v2611_v18 = vor.u32 %v3166_v5, %v2610_v58  ;;  %v2842_v30 = vld [vmem:[%s4859_s11 + $0x1d8] sm:$0xf]  ;;  %v3223_v37 = vld [vmem:[%s4859_s11 + $0x1f0] sm:$0xf0] }
 0x31b   :  { %v2835_v19 = vor.u32 %v3222_v9, %v2834_v6  ;;  %v4836_v58 = vld [vmem:[%s4860_s12] sm:$0x7f] }
 0x31c   :  { %v1271_v5 = vperm.slane %v4836_v58, 1  ;;  %v1270_v9 = vperm.slane %v4836_v58, 0 }
 0x31d   :  { %1966 = vmatpush.bf16.msrb.mxu2 %v2751_v16  ;;  %1979 = vmatpush.bf16.msra.mxu3 %v2975_v17  ;;  %v3038_v16 = vld [vmem:[%s4859_s11 + $0x360] sm:$0xf]  ;;  %v3272_v17 = vld [vmem:[%s4859_s11 + $0x378] sm:$0xf0] }
 0x31e   :  { %1992 = vmatpush.bf16.msra.mxu0 %v2755_v20  ;;  %2005 = vmatpush.bf16.msrb.mxu1 %v2979_v21  ;;  %v2615_v20 = vor.u32 %v3163_v10, %v2612_v11  ;;  %v2839_v21 = vor.u32 %v3219_v12, %v2836_v13  ;;  %v3039_v23 = vor.u32 %v3272_v17, %v3038_v16 }
 0x321   :  { %1967 = vmatpush.bf16.msrb.mxu2 %v2723_v28  ;;  %1980 = vmatpush.bf16.msra.mxu3 %v2947_v29  ;;  %v2787_v28 = vor.u32 %v3209_v25, %v2786_v24  ;;  %v3011_v29 = vor.u32 %v3265_v27, %v3010_v26  ;;  %v1272_v27 = vperm.slane %v4836_v58, 2 }
 0x322   :  { %1993 = vmatpush.bf16.msra.mxu0 %v2727_v33  ;;  %2006 = vmatpush.bf16.msrb.mxu1 %v2951_v34  ;;  %v2982_v33 = vld [vmem:[%s4859_s11 + $0x2f0] sm:$0xf]  ;;  %v3258_v34 = vld [vmem:[%s4859_s11 + $0x308] sm:$0xf0] }
 0x323   :  { %1920 = vmatmul.bf16.vlgmr.msra.gmra.mxu2 %v4551_v56  ;;  %1933 = vmatmul.bf16.vlgmr.msrb.gmra.mxu3 %v4553_v57  ;;  %v2983_v36 = vor.u32 %v3258_v34, %v2982_v33 }
 0x324   :  { %1946 = vmatmul.bf16.vlgmr.msrb.gmra.mxu0 %v4551_v56  ;;  %1959 = vmatmul.bf16.vlgmr.msra.gmra.mxu1 %v4553_v57 }
 0x325   :  { %1968 = vmatpush.bf16.msrb.mxu2 %v2695_v42  ;;  %1981 = vmatpush.bf16.msra.mxu3 %v2919_v44  ;;  %v2731_v42 = vor.u32 %v3195_v39, %v2730_v38  ;;  %v2955_v44 = vor.u32 %v3251_v41, %v2954_v40 }
 0x326   :  { %1994 = vmatpush.bf16.msra.mxu0 %v2699_v47  ;;  %2007 = vmatpush.bf16.msrb.mxu1 %v2923_v48  ;;  %v2926_v47 = vld [vmem:[%s4859_s11 + $0x280] sm:$0xf]  ;;  %v3244_v48 = vld [vmem:[%s4859_s11 + $0x298] sm:$0xf0] }
 0x327   :  { %v2927_v50 = vor.u32 %v3244_v48, %v2926_v47 }
 0x329   :  { %1969 = vmatpush.bf16.msrb.mxu2 %v2667_v59  ;;  %1982 = vmatpush.bf16.msra.mxu3 %v2891_v60  ;;  %v2675_v59 = vor.u32 %v3181_v53, %v2674_v52  ;;  %v2899_v60 = vor.u32 %v3237_v55, %v2898_v54 }
 0x32a   :  { %1995 = vmatpush.bf16.msra.mxu0 %v2671_v63  ;;  %2008 = vmatpush.bf16.msrb.mxu1 %v2895_v0  ;;  %v2870_v63 = vld [vmem:[%s4859_s11 + $0x210] sm:$0xf]  ;;  %v3230_v0 = vld [vmem:[%s4859_s11 + $0x228] sm:$0xf0]  ;;  %s3331_s11 = smov [#allocation2]  }
 0x32b   :  { %v2871_v51 = vor.u32 %v3230_v0, %v2870_v63  ;;  %s2091_s12 = sshll.u32 %s3331_s11, 4  ;;  %s2092_s12 = int_to_ptr.vmem [resolvable:$true] %s2091_s12 }
 0x32d   :  { %1970 = vmatpush.bf16.msrb.mxu2 %v2639_v2  ;;  %1983 = vmatpush.bf16.msra.mxu3 %v2863_v4  ;;  %v2619_v2 = vor.u32 %v3167_v43, %v2618_v3  ;;  %v2843_v4 = vor.u32 %v3223_v37, %v2842_v30 }
 0x32e   :  { %1996 = vmatpush.bf16.msra.mxu0 %v2643_v7  ;;  %2009 = vmatpush.bf16.msrb.mxu1 %v2867_v8 }
 0x331   :  { %1971 = vmatpush.bf16.msrb.mxu2 %v2611_v18  ;;  %1984 = vmatpush.bf16.msra.mxu3 %v2835_v19 }
 0x332   :  { %1997 = vmatpush.bf16.msra.mxu0 %v2615_v20  ;;  %2010 = vmatpush.bf16.msrb.mxu1 %v2839_v21  ;;  %v1273_v21 = vperm.slane %v4836_v58, 3 }
 0x334   :  { %1972 = vmatmul.bf16.vlgmr.msrb.gmra.mxu2 %v4551_v56  ;;  %1985 = vmatmul.bf16.vlgmr.msra.gmra.mxu3 %v4553_v57 }
 0x335   :  { %2016 = vmatpush.bf16.msra.mxu2 %v2815_v22  ;;  %2029 = vmatpush.bf16.msrb.mxu3 %v3039_v23 }
 0x336   :  { %1998 = vmatmul.bf16.vlgmr.msra.gmra.mxu0 %v4551_v56  ;;  %2011 = vmatmul.bf16.vlgmr.msrb.gmra.mxu1 %v4553_v57 }
 0x339   :  { %2017 = vmatpush.bf16.msra.mxu2 %v2787_v28  ;;  %2030 = vmatpush.bf16.msrb.mxu3 %v3011_v29 }
 0x33d   :  { %2018 = vmatpush.bf16.msra.mxu2 %v2759_v35  ;;  %2031 = vmatpush.bf16.msrb.mxu3 %v2983_v36 }
 0x341   :  { %2019 = vmatpush.bf16.msra.mxu2 %v2731_v42  ;;  %2032 = vmatpush.bf16.msrb.mxu3 %v2955_v44 }
 0x345   :  { %2020 = vmatpush.bf16.msra.mxu2 %v2703_v49  ;;  %2033 = vmatpush.bf16.msrb.mxu3 %v2927_v50  ;;  %v1275_v49 = vperm.slane %v4836_v58, 5 }
 0x349   :  { %2021 = vmatpush.bf16.msra.mxu2 %v2675_v59  ;;  %2034 = vmatpush.bf16.msrb.mxu3 %v2899_v60  ;;  %v1274_v59 = vperm.slane %v4836_v58, 4 }
 0x34d   :  { %2022 = vmatpush.bf16.msra.mxu2 %v2647_v1  ;;  %2035 = vmatpush.bf16.msrb.mxu3 %v2871_v51 }
 0x351   :  { %2023 = vmatpush.bf16.msra.mxu2 %v2619_v2  ;;  %2036 = vmatpush.bf16.msrb.mxu3 %v2843_v4 }
 0x354   :  { %2024 = vmatmul.bf16.vlgmr.msra.gmra.mxu2 %v4551_v56  ;;  %2037 = vmatmul.bf16.vlgmr.msrb.gmra.mxu3 %v4553_v57 }
 0x391   :  { %v1895_v6 = vpop.f32.mrf.mxu0  ;;  %v1908_v7 = vpop.f32.mrf.mxu1 }
 0x392   :  { %v1896_v8 = vadd.f32 %v1895_v6, %v1271_v5 }
 0x394   :  { %v1909_v10 = vadd.f32 %v1908_v7, %v1896_v8 }
 0x396   :  { %v2043_v11 = vsub.f32 0.0, %v1909_v10  ;;  %v1869_v12 = vpop.f32.mrf.mxu2  ;;  %v1882_v13 = vpop.f32.mrf.mxu3 }
 0x397   :  { %v1870_v14 = vadd.f32 %v1869_v12, %v1270_v9 }
 0x398   :  { %v2051_v56 = vmul.f32 1.442695, %v2043_v11 }
 0x399   :  { %v1883_v15 = vadd.f32 %v1882_v13, %v1870_v14  ;;  %v1897_v57 = vpop.f32.mrf.mxu0  ;;  %v1910_v16 = vpop.f32.mrf.mxu1 }
 0x39a   :  { %3277 = vpow2.f32 %v2051_v56  ;;  %v1276_v57 = vperm.slane %v4836_v58, 6 }
 0x39b   :  { %v2042_v17 = vsub.f32 0.0, %v1883_v15 }
 0x39d   :  { %v2049_v18 = vmul.f32 1.442695, %v2042_v17 }
 0x39e   :  { %v1871_v19 = vpop.f32.mrf.mxu2  ;;  %v1884_v20 = vpop.f32.mrf.mxu3 }
 0x39f   :  { %3279 = vpow2.f32 %v2049_v18 }
 0x3a0   :  { %v3278_v22 = vpop.eup %3277 }
 0x3a1   :  { %v1947_v23 = vpop.f32.mrf.mxu0  ;;  %v1960_v24 = vpop.f32.mrf.mxu1  ;;  %v2064_v26 = vadd.f32 1.0, %v3278_v22 }
 0x3a2   :  { %v1948_v25 = vadd.f32 %v1947_v23, %v1273_v21 }
 0x3a3   :  { %3281 = vrcp.f32 %v2064_v26 }
 0x3a4   :  { %v1961_v28 = vadd.f32 %v1960_v24, %v1948_v25 }
 0x3a5   :  { %v3280_v29 = vpop.eup %3279 }
 0x3a6   :  { %v2063_v31 = vadd.f32 1.0, %v3280_v29  ;;  %v2045_v32 = vsub.f32 0.0, %v1961_v28  ;;  %v1921_v33 = vpop.f32.mrf.mxu2  ;;  %v1934_v34 = vpop.f32.mrf.mxu3 }
 0x3a7   :  { %v1922_v35 = vadd.f32 %v1921_v33, %v1272_v27 }
 0x3a8   :  { %3283 = vrcp.f32 %v2063_v31  ;;  %v2055_v36 = vmul.f32 1.442695, %v2045_v32 }
 0x3a9   :  { %v1935_v38 = vadd.f32 %v1934_v34, %v1922_v35  ;;  %v1949_v39 = vpop.f32.mrf.mxu0  ;;  %v1962_v40 = vpop.f32.mrf.mxu1 }
 0x3aa   :  { %3285 = vpow2.f32 %v2055_v36  ;;  %v3282_v42 = vpop.eup %3281 }
 0x3ab   :  { %v2044_v41 = vsub.f32 0.0, %v1935_v38 }
 0x3ad   :  { %v2053_v44 = vmul.f32 1.442695, %v2044_v41 }
 0x3ae   :  { %v3284_v45 = vpop.eup %3283  ;;  %v1923_v46 = vpop.f32.mrf.mxu2 }
 0x3af   :  { %v1936_v47 = vpop.f32.mrf.mxu3  ;;  %v2077_v48 = vpack.c.bf16 %v3282_v42, %v3284_v45  ;;  %3287 = vpow2.f32 %v2053_v44 }
 0x3b0   :  { %v3286_v50 = vpop.eup %3285 }
 0x3b1   :  { %2081 = vst [vmem:[#allocation2] sm:$0xff] %v2077_v48  ;;  %v2066_v54 = vadd.f32 1.0, %v3286_v50 }
 0x3b3   :  { %v1999_v52 = vpop.f32.mrf.mxu0  ;;  %v2012_v53 = vpop.f32.mrf.mxu1  ;;  %3289 = vrcp.f32 %v2066_v54 }
 0x3b4   :  { %v2000_v55 = vadd.f32 %v1999_v52, %v1275_v49 }
 0x3b5   :  { %v3288_v60 = vpop.eup %3287 }
 0x3b6   :  { %v2013_v61 = vadd.f32 %v2012_v53, %v2000_v55  ;;  %v2065_v62 = vadd.f32 1.0, %v3288_v60 }
 0x3b7   :  { %v1973_v0 = vpop.f32.mrf.mxu2  ;;  %v1986_v1 = vpop.f32.mrf.mxu3 }
 0x3b8   :  { %v2047_v63 = vsub.f32 0.0, %v2013_v61  ;;  %3291 = vrcp.f32 %v2065_v62  ;;  %v1974_v51 = vadd.f32 %v1973_v0, %v1274_v59 }
 0x3b9   :  { %v3290_v4 = vpop.eup %3289 }
 0x3ba   :  { %v2059_v3 = vmul.f32 1.442695, %v2047_v63  ;;  %v1987_v43 = vadd.f32 %v1986_v1, %v1974_v51 }
 0x3bb   :  { %v2001_v30 = vpop.f32.mrf.mxu0  ;;  %v2014_v37 = vpop.f32.mrf.mxu1 }
 0x3bc   :  { %3293 = vpow2.f32 %v2059_v3  ;;  %v2046_v2 = vsub.f32 0.0, %v1987_v43 }
 0x3be   :  { %v3292_v5 = vpop.eup %3291  ;;  %v2057_v6 = vmul.f32 1.442695, %v2046_v2 }
 0x3bf   :  { %v2078_v7 = vpack.c.bf16 %v3290_v4, %v3292_v5  ;;  %v1975_v8 = vpop.f32.mrf.mxu2  ;;  %v1988_v9 = vpop.f32.mrf.mxu3 }
 0x3c0   :  { %3295 = vpow2.f32 %v2057_v6 }
 0x3c1   :  { %2082 = vst [vmem:[#allocation2 + $0x8] sm:$0xff] %v2078_v7 }
 0x3c2   :  { %v3294_v10 = vpop.eup %3293 }
 0x3c3   :  { %v2068_v11 = vadd.f32 1.0, %v3294_v10 }
 0x3c5   :  { %3297 = vrcp.f32 %v2068_v11 }
 0x3c6   :  { %v3296_v12 = vpop.eup %3295 }
 0x3c7   :  { %v2067_v13 = vadd.f32 1.0, %v3296_v12 }
 0x3c9   :  { %3299 = vrcp.f32 %v2067_v13 }
 0x3cb   :  { %v3298_v14 = vpop.eup %3297 }
 0x3cf   :  { %v3300_v56 = vpop.eup %3299 }
 0x3d0   :  { %v2079_v15 = vpack.c.bf16 %v3298_v14, %v3300_v56 }
 0x3d2   :  { %2083 = vst [vmem:[#allocation2 + $0x10] sm:$0xff] %v2079_v15 }
 0x3d7   :  { %v2025_v16 = vpop.f32.mrf.mxu2  ;;  %v2038_v17 = vpop.f32.mrf.mxu3 }
 0x3d8   :  { %v2026_v18 = vadd.f32 %v2025_v16, %v1276_v57 }
 0x3da   :  { %v2039_v19 = vadd.f32 %v2038_v17, %v2026_v18 }
 0x3dc   :  { %v2048_v20 = vsub.f32 0.0, %v2039_v19 }
 0x3de   :  { %v2061_v21 = vmul.f32 1.442695, %v2048_v20 }
 0x3df   :  { %v2027_v22 = vpop.f32.mrf.mxu2  ;;  %v2040_v23 = vpop.f32.mrf.mxu3 }
 0x3e0   :  { %3301 = vpow2.f32 %v2061_v21 }
 0x3e6   :  { %v3302_v24 = vpop.eup %3301 }
 0x3e7   :  { %v2069_v25 = vadd.f32 1.0, %v3302_v24 }
 0x3e9   :  { %3303 = vrcp.f32 %v2069_v25 }
 0x3ef   :  { %v3304_v26 = vpop.eup %3303 }
 0x3f0   :  { %v2080_v58 = vpack.c.bf16 %v3304_v26, %v3304_v26 }
 0x3f2   :  { %2085 = vst.msk [vmem:[#allocation2 + $0x18] sm:$0xf] %vm2084_vm4, %v2080_v58 }
 0x3f3   :  { %2096 = dma.vmem_to_hbm [thread:$0]  %s2092_s12, 448, %s2094_s26, [#allocation3]  }
 0x3f4   :  { %3329 = dma.done.wait [#allocation3], 448  }
 0x3f5   :  { %3330 = vsyncadd [#allocation3], 4294966848 }
 0x3f6   :  { %2101 = vsyncpa [#allocation3], 1 }

</bundles_post_ra>
